<compile_context>
chip_gen: v6e
topology: v6e:2x2x1
jax: 0.10.0
libtpu: 0.0.40
codegen_flags: <defaults>
</compile_context>

<pallas_src>
import functools

import jax
import jax.numpy as jnp
from jax.experimental import pallas as pl
from jax.experimental.pallas import tpu as pltpu


# --------------------------------------------------------------------------- #
# Kernel
# --------------------------------------------------------------------------- #
def _lstm_predictor_kernel(x_ref, wih1_ref, b1_ref, whh1_ref, wih2_ref, b2_ref,
                           w_h2fut_ref, b1fut_ref, wlin_ref, blin_ref, out_ref,
                           *, n_hidden, seq_len, future):
    """x_ref: (NB, L)   out_ref: (NB, L+future).

    Weights are feature-major (in, 4H); gate columns permuted to (i, f, o, g)
    and the i/f/o columns pre-scaled by 0.5 (tanh-only activation trick).
    """
    H = n_hidden
    N = x_ref.shape[0]
    f32 = jnp.float32

    wih1 = wih1_ref[...]        # (1, 4H)   input weight row of cell 1 (in=1)
    b1 = b1_ref[...]            # (1, 4H)   b_ih1 + b_hh1
    whh1 = whh1_ref[...]        # (H, 4H)
    wih2 = wih2_ref[...]        # (H, 4H)
    b2 = b2_ref[...]            # (1, 4H)   b_ih2 + b_hh2
    w_h2fut = w_h2fut_ref[...]  # (H, 8H)   [wlin^T @ wih1 | w_hh2^T]  (head folded)
    b1fut = b1fut_ref[...]      # (1, 4H)   b1 + b_lin * wih1
    wlin = wlin_ref[...]        # (1, H)    (unscaled linear head)
    blin = blin_ref[...]        # (1, 1)

    # cell-2 recurrent weight is the second lane-block of the fused future weight
    whh2 = w_h2fut[:, 4 * H:]   # (H, 4H)

    def cell_update(g, c):
        # columns [i|f|o] pre-scaled by 0.5 -> sigmoid = 0.5*tanh + 0.5; [g] -> tanh
        t = jnp.tanh(g)                         # one EUP pass over (N, 4H)
        sg = 0.5 * t[:, :3 * H] + 0.5
        i = sg[:, 0:H]
        f = sg[:, H:2 * H]
        o = sg[:, 2 * H:3 * H]
        gg = t[:, 3 * H:]
        c_new = f * c + i * gg
        h_new = o * jnp.tanh(c_new)
        return h_new, c_new

    # Hoist the input contribution out of the serial loop:
    #   xg[t] = x[:, t] * wih1 + b1   for all teacher-forced steps (one VPU pass).
    x = x_ref[...].astype(f32)                                   # (N, L)
    xg = x.T[:, :, None] * wih1[None, :, :] + b1[None, :, :]     # (L, N, 4H)

    zeros = jnp.zeros((N, H), f32)
    h1, c1, h2, c2 = zeros, zeros, zeros, zeros
    h2_hist = []

    # ---- teacher-forced sequence phase (static unroll) ----
    for t in range(seq_len):
        # Both recurrent matmuls depend only on step-entry state -> issue together.
        r1 = jnp.dot(h1, whh1, preferred_element_type=f32)        # (N, 4H)
        r2 = jnp.dot(h2, whh2, preferred_element_type=f32)        # (N, 4H)
        h1, c1 = cell_update(xg[t] + r1, c1)
        g2 = jnp.dot(h1, wih2, preferred_element_type=f32) + r2 + b2
        h2, c2 = cell_update(g2, c2)
        h2_hist.append(h2)

    # ---- autoregressive future phase (linear head folded into the feedback) ----
    for _ in range(future):
        r1 = jnp.dot(h1, whh1, preferred_element_type=f32)        # (N, 4H)
        r2b = jnp.dot(h2, w_h2fut, preferred_element_type=f32)    # (N, 8H) fused
        h1, c1 = cell_update(r1 + r2b[:, :4 * H] + b1fut, c1)
        g2 = jnp.dot(h1, wih2, preferred_element_type=f32) + r2b[:, 4 * H:] + b2
        h2, c2 = cell_update(g2, c2)
        h2_hist.append(h2)

    # ---- linear head + single full-width store, off the recurrence ----
    ys = [jnp.sum(h2_t * wlin, axis=1, keepdims=True) for h2_t in h2_hist]
    out_ref[...] = jnp.concatenate(ys, axis=1) + blin             # (N, L+future)


# --------------------------------------------------------------------------- #
# One-time parameter packing (outside the hot call path)
# --------------------------------------------------------------------------- #
def pack_params(params, n_hidden):
    H = n_hidden
    f32 = jnp.float32
    # PyTorch gate order (i, f, g, o) -> kernel order (i, f, o, g)
    perm = jnp.concatenate([jnp.arange(0, 2 * H),
                            jnp.arange(3 * H, 4 * H),
                            jnp.arange(2 * H, 3 * H)])
    # i/f/o columns scaled by 0.5 so sigmoid == 0.5 * tanh + 0.5
    scale = jnp.concatenate([jnp.full((3 * H,), 0.5, f32),
                             jnp.ones((H,), f32)]).reshape(1, 4 * H)

    def prep(w_t):  # w_t: (in_features, 4H) feature-major
        return jnp.take(w_t.astype(f32), perm, axis=-1) * scale

    wih1 = prep(params["w_ih1"].T)                                          # (1, 4H)
    whh1 = prep(params["w_hh1"].T)                                          # (H, 4H)
    b1 = prep((params["b_ih1"] + params["b_hh1"]).reshape(1, 4 * H))        # (1, 4H)
    wih2 = prep(params["w_ih2"].T)                                          # (H, 4H)
    whh2 = prep(params["w_hh2"].T)                                          # (H, 4H)
    b2 = prep((params["b_ih2"] + params["b_hh2"]).reshape(1, 4 * H))        # (1, 4H)
    wlin = params["w_lin"].reshape(1, H).astype(f32)                        # (1, H)
    blin = params["b_lin"].reshape(1, 1).astype(f32)                        # (1, 1)

    # Fold the linear head into the future-phase feedback, fused with w_hh2^T.
    w_fb = wlin.T @ wih1                                                    # (H, 4H)
    b1fut = b1 + blin * wih1                                                # (1, 4H)
    w_h2fut = jnp.concatenate([w_fb, whh2], axis=1)                         # (H, 8H)

    return dict(wih1=wih1, b1=b1, whh1=whh1, wih2=wih2, b2=b2,
                w_h2fut=w_h2fut, b1fut=b1fut, wlin=wlin, blin=blin)


# --------------------------------------------------------------------------- #
# Wrapper
# --------------------------------------------------------------------------- #
def _round_up(v, m):
    return (v + m - 1) // m * m


def lstm_predictor_forward(x, packed, *, n_hidden, future=0):
    """x: (N, L) float32 -> (N, L+future) float32 (PyTorch LSTMPredictor semantics)."""
    N, L = x.shape
    H = n_hidden
    T = L + future

    # Batch tile: cap at 64 (keeps the unrolled live set inside the 64-vreg file)
    # and use >=2 grid programs whenever the padded batch allows (v7x: 2 TCs).
    n8 = _round_up(N, 8)
    nb = 64
    if n8 < 2 * nb:
        nb = _round_up((n8 + 1) // 2, 8) if n8 >= 16 else n8
    n_pad = _round_up(n8, nb)
    x_pad = jnp.zeros((n_pad, L), jnp.float32).at[:N, :].set(x.astype(jnp.float32))

    kernel = functools.partial(_lstm_predictor_kernel,
                               n_hidden=H, seq_len=L, future=future)

    def fixed(a):
        return pl.BlockSpec(a.shape, lambda i: (0, 0))

    p = packed
    out = pl.pallas_call(
        kernel,
        out_shape=jax.ShapeDtypeStruct((n_pad, T), jnp.float32),
        grid=(n_pad // nb,),
        in_specs=[
            pl.BlockSpec((nb, L), lambda i: (i, 0)),   # x (batch-tiled)
            fixed(p["wih1"]), fixed(p["b1"]), fixed(p["whh1"]), fixed(p["wih2"]),
            fixed(p["b2"]), fixed(p["w_h2fut"]), fixed(p["b1fut"]),
            fixed(p["wlin"]), fixed(p["blin"]),
        ],
        out_specs=pl.BlockSpec((nb, T), lambda i: (i, 0)),
        compiler_params=pltpu.CompilerParams(dimension_semantics=("parallel",)),
    )(x_pad, p["wih1"], p["b1"], p["whh1"], p["wih2"], p["b2"],
      p["w_h2fut"], p["b1fut"], p["wlin"], p["blin"])

    return out[:N, :]


# --------------------------------------------------------------------------- #
# Reference + demo
# --------------------------------------------------------------------------- #
def init_params(key, n_hidden):
    """Deterministic init matching PyTorch default shapes (uniform +/- 1/sqrt(H))."""
    H = n_hidden
    k = 1.0 / jnp.sqrt(jnp.float32(H))
    keys = jax.random.split(key, 10)
    u = lambda kk, shape: jax.random.uniform(kk, shape, jnp.float32, -k, k)
    return {
        "w_ih1": u(keys[0], (4 * H, 1)),
        "w_hh1": u(keys[1], (4 * H, H)),
        "b_ih1": u(keys[2], (4 * H,)),
        "b_hh1": u(keys[3], (4 * H,)),
        "w_ih2": u(keys[4], (4 * H, H)),
        "w_hh2": u(keys[5], (4 * H, H)),
        "b_ih2": u(keys[6], (4 * H,)),
        "b_hh2": u(keys[7], (4 * H,)),
        "w_lin": u(keys[8], (1, H)),
        "b_lin": u(keys[9], (1,)),
    }


def reference_forward(x, p, *, n_hidden, future=0):
    """Pure-JAX reference matching torch.nn.LSTMCell / Linear semantics."""
    N, L = x.shape
    H = n_hidden

    def cell(xt, h, c, wih, whh, bih, bhh):
        g = xt @ wih.T + bih + h @ whh.T + bhh
        i, f, gg, o = jnp.split(g, 4, axis=1)
        c_new = jax.nn.sigmoid(f) * c + jax.nn.sigmoid(i) * jnp.tanh(gg)
        h_new = jax.nn.sigmoid(o) * jnp.tanh(c_new)
        return h_new, c_new

    h1 = c1 = h2 = c2 = jnp.zeros((N, H), jnp.float32)
    outs = []
    out = jnp.zeros((N, 1), jnp.float32)
    for t in range(L + future):
        xt = x[:, t:t + 1] if t < L else out
        h1, c1 = cell(xt, h1, c1, p["w_ih1"], p["w_hh1"], p["b_ih1"], p["b_hh1"])
        h2, c2 = cell(h1, h2, c2, p["w_ih2"], p["w_hh2"], p["b_ih2"], p["b_hh2"])
        out = h2 @ p["w_lin"].T + p["b_lin"]
        outs.append(out)
    return jnp.concatenate(outs, axis=1)


if __name__ == "__main__":
    key = jax.random.PRNGKey(0)
    k_param, k_x = jax.random.split(key)

    N_BATCH, SEQ_LEN, HIDDEN, FUTURE = 4, 8, 32, 4

    params = init_params(k_param, HIDDEN)
    x = jax.random.normal(k_x, (N_BATCH, SEQ_LEN), jnp.float32)

    packed = pack_params(params, HIDDEN)          # one-time packing, off hot path
    out = lstm_predictor_forward(x, packed, n_hidden=HIDDEN, future=FUTURE)
    out = jax.block_until_ready(out)

    ref = reference_forward(x, params, n_hidden=HIDDEN, future=FUTURE)
    assert out.shape == (N_BATCH, SEQ_LEN + FUTURE), out.shape
    assert jnp.allclose(out, ref, atol=1e-3, rtol=1e-3), (
        f"max abs err {jnp.max(jnp.abs(out - ref))}")

    print("KERNEL_OK")
</pallas_src>

<mosaic_0001>
module attributes {stable_mosaic.version = 11 : i64} {
  func.func @_lstm_predictor_kernel(%arg0: i32, %arg1: memref<8x8xf32, #tpu.memory_space<vmem>>, %arg2: memref<1x128xf32, #tpu.memory_space<vmem>>, %arg3: memref<1x128xf32, #tpu.memory_space<vmem>>, %arg4: memref<32x128xf32, #tpu.memory_space<vmem>>, %arg5: memref<32x128xf32, #tpu.memory_space<vmem>>, %arg6: memref<1x128xf32, #tpu.memory_space<vmem>>, %arg7: memref<32x256xf32, #tpu.memory_space<vmem>>, %arg8: memref<1x128xf32, #tpu.memory_space<vmem>>, %arg9: memref<1x32xf32, #tpu.memory_space<vmem>>, %arg10: memref<1x1xf32, #tpu.memory_space<vmem>>, %arg11: memref<8x12xf32, #tpu.memory_space<vmem>>) attributes {dimension_semantics = [#tpu.dimension_semantics<parallel>], iteration_bounds = array<i64: 1>, scalar_prefetch = 0 : i64, scratch_operands = 0 : i64, tpu.core_type = #tpu.core_type<tc>, window_params = [{transform_indices = @transform_0, window_bounds = array<i64: 8, 8>}, {pipeline_mode = #tpu.pipeline_mode<synchronous>, transform_indices = @transform_1, window_bounds = array<i64: 1, 128>}, {pipeline_mode = #tpu.pipeline_mode<synchronous>, transform_indices = @transform_2, window_bounds = array<i64: 1, 128>}, {pipeline_mode = #tpu.pipeline_mode<synchronous>, transform_indices = @transform_3, window_bounds = array<i64: 32, 128>}, {pipeline_mode = #tpu.pipeline_mode<synchronous>, transform_indices = @transform_4, window_bounds = array<i64: 32, 128>}, {pipeline_mode = #tpu.pipeline_mode<synchronous>, transform_indices = @transform_5, window_bounds = array<i64: 1, 128>}, {pipeline_mode = #tpu.pipeline_mode<synchronous>, transform_indices = @transform_6, window_bounds = array<i64: 32, 256>}, {pipeline_mode = #tpu.pipeline_mode<synchronous>, transform_indices = @transform_7, window_bounds = array<i64: 1, 128>}, {pipeline_mode = #tpu.pipeline_mode<synchronous>, transform_indices = @transform_8, window_bounds = array<i64: 1, 32>}, {pipeline_mode = #tpu.pipeline_mode<synchronous>, transform_indices = @transform_9, window_bounds = array<i64: 1, 1>}, {transform_indices = @transform_10, window_bounds = array<i64: 8, 12>}]} {
    %c0 = arith.constant 0 : index
    %c0_0 = arith.constant 0 : index
    %0 = vector.load %arg2[%c0, %c0_0] : memref<1x128xf32, #tpu.memory_space<vmem>>, vector<1x128xf32>
    %c0_1 = arith.constant 0 : index
    %c0_2 = arith.constant 0 : index
    %1 = vector.load %arg3[%c0_1, %c0_2] : memref<1x128xf32, #tpu.memory_space<vmem>>, vector<1x128xf32>
    %c0_3 = arith.constant 0 : index
    %c0_4 = arith.constant 0 : index
    %2 = vector.load %arg4[%c0_3, %c0_4] : memref<32x128xf32, #tpu.memory_space<vmem>>, vector<32x128xf32>
    %c0_5 = arith.constant 0 : index
    %c0_6 = arith.constant 0 : index
    %3 = vector.load %arg5[%c0_5, %c0_6] : memref<32x128xf32, #tpu.memory_space<vmem>>, vector<32x128xf32>
    %c0_7 = arith.constant 0 : index
    %c0_8 = arith.constant 0 : index
    %4 = vector.load %arg6[%c0_7, %c0_8] : memref<1x128xf32, #tpu.memory_space<vmem>>, vector<1x128xf32>
    %c0_9 = arith.constant 0 : index
    %c0_10 = arith.constant 0 : index
    %5 = vector.load %arg7[%c0_9, %c0_10] : memref<32x256xf32, #tpu.memory_space<vmem>>, vector<32x256xf32>
    %c0_11 = arith.constant 0 : index
    %c0_12 = arith.constant 0 : index
    %6 = vector.load %arg8[%c0_11, %c0_12] : memref<1x128xf32, #tpu.memory_space<vmem>>, vector<1x128xf32>
    %c0_13 = arith.constant 0 : index
    %c0_14 = arith.constant 0 : index
    %7 = vector.load %arg9[%c0_13, %c0_14] : memref<1x32xf32, #tpu.memory_space<vmem>>, vector<1x32xf32>
    %c0_15 = arith.constant 0 : index
    %c0_16 = arith.constant 0 : index
    %8 = vector.load %arg10[%c0_15, %c0_16] : memref<1x1xf32, #tpu.memory_space<vmem>>, vector<1x1xf32>
    %9 = vector.extract_strided_slice %5 {offsets = [0, 128], sizes = [32, 128], strides = [1, 1]} : vector<32x256xf32> to vector<32x128xf32>
    %c0_17 = arith.constant 0 : index
    %c0_18 = arith.constant 0 : index
    %10 = vector.load %arg1[%c0_17, %c0_18] : memref<8x8xf32, #tpu.memory_space<vmem>>, vector<8x8xf32>
    %11 = tpu.transpose %10, [1, 0] : vector<8x8xf32> -> vector<8x8xf32>
    %12 = vector.shape_cast %11 : vector<8x8xf32> to vector<8x8x1xf32>
    %13 = vector.shape_cast %0 : vector<1x128xf32> to vector<1x1x128xf32>
    %14 = vector.broadcast %12 : vector<8x8x1xf32> to vector<8x8x128xf32>
    %15 = vector.broadcast %13 : vector<1x1x128xf32> to vector<8x8x128xf32>
    %16 = arith.mulf %14, %15 : vector<8x8x128xf32>
    %17 = vector.shape_cast %1 : vector<1x128xf32> to vector<1x1x128xf32>
    %18 = vector.broadcast %17 : vector<1x1x128xf32> to vector<8x8x128xf32>
    %19 = arith.addf %16, %18 : vector<8x8x128xf32>
    %cst = arith.constant 0.000000e+00 : f32
    %20 = vector.broadcast %cst : f32 to vector<8x32xf32>
    %cst_19 = arith.constant dense<0.000000e+00> : vector<8x128xf32>
    %21 = tpu.matmul %20, %2, %cst_19 {dimension_numbers = #tpu.dot_dimension_numbers<[1], [0], [0], [1], [0, 0, 1, 1], [], []>} : vector<8x32xf32>, vector<32x128xf32>, vector<8x128xf32> -> vector<8x128xf32>
    %cst_20 = arith.constant dense<0.000000e+00> : vector<8x128xf32>
    %22 = tpu.matmul %20, %9, %cst_20 {dimension_numbers = #tpu.dot_dimension_numbers<[1], [0], [0], [1], [0, 0, 1, 1], [], []>} : vector<8x32xf32>, vector<32x128xf32>, vector<8x128xf32> -> vector<8x128xf32>
    %23 = vector.extract_strided_slice %19 {offsets = [0, 0, 0], sizes = [1, 8, 128], strides = [1, 1, 1]} : vector<8x8x128xf32> to vector<1x8x128xf32>
    %24 = vector.shape_cast %23 : vector<1x8x128xf32> to vector<8x128xf32>
    %25 = arith.addf %24, %21 : vector<8x128xf32>
    %26 = math.tanh %25 : vector<8x128xf32>
    %27 = vector.extract_strided_slice %26 {offsets = [0, 0], sizes = [8, 96], strides = [1, 1]} : vector<8x128xf32> to vector<8x96xf32>
    %cst_21 = arith.constant 5.000000e-01 : f32
    %28 = vector.broadcast %cst_21 : f32 to vector<8x96xf32>
    %29 = arith.mulf %28, %27 : vector<8x96xf32>
    %cst_22 = arith.constant 5.000000e-01 : f32
    %30 = vector.broadcast %cst_22 : f32 to vector<8x96xf32>
    %31 = arith.addf %29, %30 : vector<8x96xf32>
    %32 = vector.extract_strided_slice %31 {offsets = [0, 0], sizes = [8, 32], strides = [1, 1]} : vector<8x96xf32> to vector<8x32xf32>
    %33 = vector.extract_strided_slice %31 {offsets = [0, 32], sizes = [8, 32], strides = [1, 1]} : vector<8x96xf32> to vector<8x32xf32>
    %34 = vector.extract_strided_slice %31 {offsets = [0, 64], sizes = [8, 32], strides = [1, 1]} : vector<8x96xf32> to vector<8x32xf32>
    %35 = vector.extract_strided_slice %26 {offsets = [0, 96], sizes = [8, 32], strides = [1, 1]} : vector<8x128xf32> to vector<8x32xf32>
    %36 = arith.mulf %33, %20 : vector<8x32xf32>
    %37 = arith.mulf %32, %35 : vector<8x32xf32>
    %38 = arith.addf %36, %37 : vector<8x32xf32>
    %39 = math.tanh %38 : vector<8x32xf32>
    %40 = arith.mulf %34, %39 : vector<8x32xf32>
    %cst_23 = arith.constant dense<0.000000e+00> : vector<8x128xf32>
    %41 = tpu.matmul %40, %3, %cst_23 {dimension_numbers = #tpu.dot_dimension_numbers<[1], [0], [0], [1], [0, 0, 1, 1], [], []>} : vector<8x32xf32>, vector<32x128xf32>, vector<8x128xf32> -> vector<8x128xf32>
    %42 = arith.addf %41, %22 : vector<8x128xf32>
    %43 = vector.broadcast %4 : vector<1x128xf32> to vector<8x128xf32>
    %44 = arith.addf %42, %43 : vector<8x128xf32>
    %45 = math.tanh %44 : vector<8x128xf32>
    %46 = vector.extract_strided_slice %45 {offsets = [0, 0], sizes = [8, 96], strides = [1, 1]} : vector<8x128xf32> to vector<8x96xf32>
    %cst_24 = arith.constant 5.000000e-01 : f32
    %47 = vector.broadcast %cst_24 : f32 to vector<8x96xf32>
    %48 = arith.mulf %47, %46 : vector<8x96xf32>
    %cst_25 = arith.constant 5.000000e-01 : f32
    %49 = vector.broadcast %cst_25 : f32 to vector<8x96xf32>
    %50 = arith.addf %48, %49 : vector<8x96xf32>
    %51 = vector.extract_strided_slice %50 {offsets = [0, 0], sizes = [8, 32], strides = [1, 1]} : vector<8x96xf32> to vector<8x32xf32>
    %52 = vector.extract_strided_slice %50 {offsets = [0, 32], sizes = [8, 32], strides = [1, 1]} : vector<8x96xf32> to vector<8x32xf32>
    %53 = vector.extract_strided_slice %50 {offsets = [0, 64], sizes = [8, 32], strides = [1, 1]} : vector<8x96xf32> to vector<8x32xf32>
    %54 = vector.extract_strided_slice %45 {offsets = [0, 96], sizes = [8, 32], strides = [1, 1]} : vector<8x128xf32> to vector<8x32xf32>
    %55 = arith.mulf %52, %20 : vector<8x32xf32>
    %56 = arith.mulf %51, %54 : vector<8x32xf32>
    %57 = arith.addf %55, %56 : vector<8x32xf32>
    %58 = math.tanh %57 : vector<8x32xf32>
    %59 = arith.mulf %53, %58 : vector<8x32xf32>
    %cst_26 = arith.constant dense<0.000000e+00> : vector<8x128xf32>
    %60 = tpu.matmul %40, %2, %cst_26 {dimension_numbers = #tpu.dot_dimension_numbers<[1], [0], [0], [1], [0, 0, 1, 1], [], []>} : vector<8x32xf32>, vector<32x128xf32>, vector<8x128xf32> -> vector<8x128xf32>
    %cst_27 = arith.constant dense<0.000000e+00> : vector<8x128xf32>
    %61 = tpu.matmul %59, %9, %cst_27 {dimension_numbers = #tpu.dot_dimension_numbers<[1], [0], [0], [1], [0, 0, 1, 1], [], []>} : vector<8x32xf32>, vector<32x128xf32>, vector<8x128xf32> -> vector<8x128xf32>
    %62 = vector.extract_strided_slice %19 {offsets = [1, 0, 0], sizes = [1, 8, 128], strides = [1, 1, 1]} : vector<8x8x128xf32> to vector<1x8x128xf32>
    %63 = vector.shape_cast %62 : vector<1x8x128xf32> to vector<8x128xf32>
    %64 = arith.addf %63, %60 : vector<8x128xf32>
    %65 = math.tanh %64 : vector<8x128xf32>
    %66 = vector.extract_strided_slice %65 {offsets = [0, 0], sizes = [8, 96], strides = [1, 1]} : vector<8x128xf32> to vector<8x96xf32>
    %cst_28 = arith.constant 5.000000e-01 : f32
    %67 = vector.broadcast %cst_28 : f32 to vector<8x96xf32>
    %68 = arith.mulf %67, %66 : vector<8x96xf32>
    %cst_29 = arith.constant 5.000000e-01 : f32
    %69 = vector.broadcast %cst_29 : f32 to vector<8x96xf32>
    %70 = arith.addf %68, %69 : vector<8x96xf32>
    %71 = vector.extract_strided_slice %70 {offsets = [0, 0], sizes = [8, 32], strides = [1, 1]} : vector<8x96xf32> to vector<8x32xf32>
    %72 = vector.extract_strided_slice %70 {offsets = [0, 32], sizes = [8, 32], strides = [1, 1]} : vector<8x96xf32> to vector<8x32xf32>
    %73 = vector.extract_strided_slice %70 {offsets = [0, 64], sizes = [8, 32], strides = [1, 1]} : vector<8x96xf32> to vector<8x32xf32>
    %74 = vector.extract_strided_slice %65 {offsets = [0, 96], sizes = [8, 32], strides = [1, 1]} : vector<8x128xf32> to vector<8x32xf32>
    %75 = arith.mulf %72, %38 : vector<8x32xf32>
    %76 = arith.mulf %71, %74 : vector<8x32xf32>
    %77 = arith.addf %75, %76 : vector<8x32xf32>
    %78 = math.tanh %77 : vector<8x32xf32>
    %79 = arith.mulf %73, %78 : vector<8x32xf32>
    %cst_30 = arith.constant dense<0.000000e+00> : vector<8x128xf32>
    %80 = tpu.matmul %79, %3, %cst_30 {dimension_numbers = #tpu.dot_dimension_numbers<[1], [0], [0], [1], [0, 0, 1, 1], [], []>} : vector<8x32xf32>, vector<32x128xf32>, vector<8x128xf32> -> vector<8x128xf32>
    %81 = arith.addf %80, %61 : vector<8x128xf32>
    %82 = vector.broadcast %4 : vector<1x128xf32> to vector<8x128xf32>
    %83 = arith.addf %81, %82 : vector<8x128xf32>
    %84 = math.tanh %83 : vector<8x128xf32>
    %85 = vector.extract_strided_slice %84 {offsets = [0, 0], sizes = [8, 96], strides = [1, 1]} : vector<8x128xf32> to vector<8x96xf32>
    %cst_31 = arith.constant 5.000000e-01 : f32
    %86 = vector.broadcast %cst_31 : f32 to vector<8x96xf32>
    %87 = arith.mulf %86, %85 : vector<8x96xf32>
    %cst_32 = arith.constant 5.000000e-01 : f32
    %88 = vector.broadcast %cst_32 : f32 to vector<8x96xf32>
    %89 = arith.addf %87, %88 : vector<8x96xf32>
    %90 = vector.extract_strided_slice %89 {offsets = [0, 0], sizes = [8, 32], strides = [1, 1]} : vector<8x96xf32> to vector<8x32xf32>
    %91 = vector.extract_strided_slice %89 {offsets = [0, 32], sizes = [8, 32], strides = [1, 1]} : vector<8x96xf32> to vector<8x32xf32>
    %92 = vector.extract_strided_slice %89 {offsets = [0, 64], sizes = [8, 32], strides = [1, 1]} : vector<8x96xf32> to vector<8x32xf32>
    %93 = vector.extract_strided_slice %84 {offsets = [0, 96], sizes = [8, 32], strides = [1, 1]} : vector<8x128xf32> to vector<8x32xf32>
    %94 = arith.mulf %91, %57 : vector<8x32xf32>
    %95 = arith.mulf %90, %93 : vector<8x32xf32>
    %96 = arith.addf %94, %95 : vector<8x32xf32>
    %97 = math.tanh %96 : vector<8x32xf32>
    %98 = arith.mulf %92, %97 : vector<8x32xf32>
    %cst_33 = arith.constant dense<0.000000e+00> : vector<8x128xf32>
    %99 = tpu.matmul %79, %2, %cst_33 {dimension_numbers = #tpu.dot_dimension_numbers<[1], [0], [0], [1], [0, 0, 1, 1], [], []>} : vector<8x32xf32>, vector<32x128xf32>, vector<8x128xf32> -> vector<8x128xf32>
    %cst_34 = arith.constant dense<0.000000e+00> : vector<8x128xf32>
    %100 = tpu.matmul %98, %9, %cst_34 {dimension_numbers = #tpu.dot_dimension_numbers<[1], [0], [0], [1], [0, 0, 1, 1], [], []>} : vector<8x32xf32>, vector<32x128xf32>, vector<8x128xf32> -> vector<8x128xf32>
    %101 = vector.extract_strided_slice %19 {offsets = [2, 0, 0], sizes = [1, 8, 128], strides = [1, 1, 1]} : vector<8x8x128xf32> to vector<1x8x128xf32>
    %102 = vector.shape_cast %101 : vector<1x8x128xf32> to vector<8x128xf32>
    %103 = arith.addf %102, %99 : vector<8x128xf32>
    %104 = math.tanh %103 : vector<8x128xf32>
    %105 = vector.extract_strided_slice %104 {offsets = [0, 0], sizes = [8, 96], strides = [1, 1]} : vector<8x128xf32> to vector<8x96xf32>
    %cst_35 = arith.constant 5.000000e-01 : f32
    %106 = vector.broadcast %cst_35 : f32 to vector<8x96xf32>
    %107 = arith.mulf %106, %105 : vector<8x96xf32>
    %cst_36 = arith.constant 5.000000e-01 : f32
    %108 = vector.broadcast %cst_36 : f32 to vector<8x96xf32>
    %109 = arith.addf %107, %108 : vector<8x96xf32>
    %110 = vector.extract_strided_slice %109 {offsets = [0, 0], sizes = [8, 32], strides = [1, 1]} : vector<8x96xf32> to vector<8x32xf32>
    %111 = vector.extract_strided_slice %109 {offsets = [0, 32], sizes = [8, 32], strides = [1, 1]} : vector<8x96xf32> to vector<8x32xf32>
    %112 = vector.extract_strided_slice %109 {offsets = [0, 64], sizes = [8, 32], strides = [1, 1]} : vector<8x96xf32> to vector<8x32xf32>
    %113 = vector.extract_strided_slice %104 {offsets = [0, 96], sizes = [8, 32], strides = [1, 1]} : vector<8x128xf32> to vector<8x32xf32>
    %114 = arith.mulf %111, %77 : vector<8x32xf32>
    %115 = arith.mulf %110, %113 : vector<8x32xf32>
    %116 = arith.addf %114, %115 : vector<8x32xf32>
    %117 = math.tanh %116 : vector<8x32xf32>
    %118 = arith.mulf %112, %117 : vector<8x32xf32>
    %cst_37 = arith.constant dense<0.000000e+00> : vector<8x128xf32>
    %119 = tpu.matmul %118, %3, %cst_37 {dimension_numbers = #tpu.dot_dimension_numbers<[1], [0], [0], [1], [0, 0, 1, 1], [], []>} : vector<8x32xf32>, vector<32x128xf32>, vector<8x128xf32> -> vector<8x128xf32>
    %120 = arith.addf %119, %100 : vector<8x128xf32>
    %121 = vector.broadcast %4 : vector<1x128xf32> to vector<8x128xf32>
    %122 = arith.addf %120, %121 : vector<8x128xf32>
    %123 = math.tanh %122 : vector<8x128xf32>
    %124 = vector.extract_strided_slice %123 {offsets = [0, 0], sizes = [8, 96], strides = [1, 1]} : vector<8x128xf32> to vector<8x96xf32>
    %cst_38 = arith.constant 5.000000e-01 : f32
    %125 = vector.broadcast %cst_38 : f32 to vector<8x96xf32>
    %126 = arith.mulf %125, %124 : vector<8x96xf32>
    %cst_39 = arith.constant 5.000000e-01 : f32
    %127 = vector.broadcast %cst_39 : f32 to vector<8x96xf32>
    %128 = arith.addf %126, %127 : vector<8x96xf32>
    %129 = vector.extract_strided_slice %128 {offsets = [0, 0], sizes = [8, 32], strides = [1, 1]} : vector<8x96xf32> to vector<8x32xf32>
    %130 = vector.extract_strided_slice %128 {offsets = [0, 32], sizes = [8, 32], strides = [1, 1]} : vector<8x96xf32> to vector<8x32xf32>
    %131 = vector.extract_strided_slice %128 {offsets = [0, 64], sizes = [8, 32], strides = [1, 1]} : vector<8x96xf32> to vector<8x32xf32>
    %132 = vector.extract_strided_slice %123 {offsets = [0, 96], sizes = [8, 32], strides = [1, 1]} : vector<8x128xf32> to vector<8x32xf32>
    %133 = arith.mulf %130, %96 : vector<8x32xf32>
    %134 = arith.mulf %129, %132 : vector<8x32xf32>
    %135 = arith.addf %133, %134 : vector<8x32xf32>
    %136 = math.tanh %135 : vector<8x32xf32>
    %137 = arith.mulf %131, %136 : vector<8x32xf32>
    %cst_40 = arith.constant dense<0.000000e+00> : vector<8x128xf32>
    %138 = tpu.matmul %118, %2, %cst_40 {dimension_numbers = #tpu.dot_dimension_numbers<[1], [0], [0], [1], [0, 0, 1, 1], [], []>} : vector<8x32xf32>, vector<32x128xf32>, vector<8x128xf32> -> vector<8x128xf32>
    %cst_41 = arith.constant dense<0.000000e+00> : vector<8x128xf32>
    %139 = tpu.matmul %137, %9, %cst_41 {dimension_numbers = #tpu.dot_dimension_numbers<[1], [0], [0], [1], [0, 0, 1, 1], [], []>} : vector<8x32xf32>, vector<32x128xf32>, vector<8x128xf32> -> vector<8x128xf32>
    %140 = vector.extract_strided_slice %19 {offsets = [3, 0, 0], sizes = [1, 8, 128], strides = [1, 1, 1]} : vector<8x8x128xf32> to vector<1x8x128xf32>
    %141 = vector.shape_cast %140 : vector<1x8x128xf32> to vector<8x128xf32>
    %142 = arith.addf %141, %138 : vector<8x128xf32>
    %143 = math.tanh %142 : vector<8x128xf32>
    %144 = vector.extract_strided_slice %143 {offsets = [0, 0], sizes = [8, 96], strides = [1, 1]} : vector<8x128xf32> to vector<8x96xf32>
    %cst_42 = arith.constant 5.000000e-01 : f32
    %145 = vector.broadcast %cst_42 : f32 to vector<8x96xf32>
    %146 = arith.mulf %145, %144 : vector<8x96xf32>
    %cst_43 = arith.constant 5.000000e-01 : f32
    %147 = vector.broadcast %cst_43 : f32 to vector<8x96xf32>
    %148 = arith.addf %146, %147 : vector<8x96xf32>
    %149 = vector.extract_strided_slice %148 {offsets = [0, 0], sizes = [8, 32], strides = [1, 1]} : vector<8x96xf32> to vector<8x32xf32>
    %150 = vector.extract_strided_slice %148 {offsets = [0, 32], sizes = [8, 32], strides = [1, 1]} : vector<8x96xf32> to vector<8x32xf32>
    %151 = vector.extract_strided_slice %148 {offsets = [0, 64], sizes = [8, 32], strides = [1, 1]} : vector<8x96xf32> to vector<8x32xf32>
    %152 = vector.extract_strided_slice %143 {offsets = [0, 96], sizes = [8, 32], strides = [1, 1]} : vector<8x128xf32> to vector<8x32xf32>
    %153 = arith.mulf %150, %116 : vector<8x32xf32>
    %154 = arith.mulf %149, %152 : vector<8x32xf32>
    %155 = arith.addf %153, %154 : vector<8x32xf32>
    %156 = math.tanh %155 : vector<8x32xf32>
    %157 = arith.mulf %151, %156 : vector<8x32xf32>
    %cst_44 = arith.constant dense<0.000000e+00> : vector<8x128xf32>
    %158 = tpu.matmul %157, %3, %cst_44 {dimension_numbers = #tpu.dot_dimension_numbers<[1], [0], [0], [1], [0, 0, 1, 1], [], []>} : vector<8x32xf32>, vector<32x128xf32>, vector<8x128xf32> -> vector<8x128xf32>
    %159 = arith.addf %158, %139 : vector<8x128xf32>
    %160 = vector.broadcast %4 : vector<1x128xf32> to vector<8x128xf32>
    %161 = arith.addf %159, %160 : vector<8x128xf32>
    %162 = math.tanh %161 : vector<8x128xf32>
    %163 = vector.extract_strided_slice %162 {offsets = [0, 0], sizes = [8, 96], strides = [1, 1]} : vector<8x128xf32> to vector<8x96xf32>
    %cst_45 = arith.constant 5.000000e-01 : f32
    %164 = vector.broadcast %cst_45 : f32 to vector<8x96xf32>
    %165 = arith.mulf %164, %163 : vector<8x96xf32>
    %cst_46 = arith.constant 5.000000e-01 : f32
    %166 = vector.broadcast %cst_46 : f32 to vector<8x96xf32>
    %167 = arith.addf %165, %166 : vector<8x96xf32>
    %168 = vector.extract_strided_slice %167 {offsets = [0, 0], sizes = [8, 32], strides = [1, 1]} : vector<8x96xf32> to vector<8x32xf32>
    %169 = vector.extract_strided_slice %167 {offsets = [0, 32], sizes = [8, 32], strides = [1, 1]} : vector<8x96xf32> to vector<8x32xf32>
    %170 = vector.extract_strided_slice %167 {offsets = [0, 64], sizes = [8, 32], strides = [1, 1]} : vector<8x96xf32> to vector<8x32xf32>
    %171 = vector.extract_strided_slice %162 {offsets = [0, 96], sizes = [8, 32], strides = [1, 1]} : vector<8x128xf32> to vector<8x32xf32>
    %172 = arith.mulf %169, %135 : vector<8x32xf32>
    %173 = arith.mulf %168, %171 : vector<8x32xf32>
    %174 = arith.addf %172, %173 : vector<8x32xf32>
    %175 = math.tanh %174 : vector<8x32xf32>
    %176 = arith.mulf %170, %175 : vector<8x32xf32>
    %cst_47 = arith.constant dense<0.000000e+00> : vector<8x128xf32>
    %177 = tpu.matmul %157, %2, %cst_47 {dimension_numbers = #tpu.dot_dimension_numbers<[1], [0], [0], [1], [0, 0, 1, 1], [], []>} : vector<8x32xf32>, vector<32x128xf32>, vector<8x128xf32> -> vector<8x128xf32>
    %cst_48 = arith.constant dense<0.000000e+00> : vector<8x128xf32>
    %178 = tpu.matmul %176, %9, %cst_48 {dimension_numbers = #tpu.dot_dimension_numbers<[1], [0], [0], [1], [0, 0, 1, 1], [], []>} : vector<8x32xf32>, vector<32x128xf32>, vector<8x128xf32> -> vector<8x128xf32>
    %179 = vector.extract_strided_slice %19 {offsets = [4, 0, 0], sizes = [1, 8, 128], strides = [1, 1, 1]} : vector<8x8x128xf32> to vector<1x8x128xf32>
    %180 = vector.shape_cast %179 : vector<1x8x128xf32> to vector<8x128xf32>
    %181 = arith.addf %180, %177 : vector<8x128xf32>
    %182 = math.tanh %181 : vector<8x128xf32>
    %183 = vector.extract_strided_slice %182 {offsets = [0, 0], sizes = [8, 96], strides = [1, 1]} : vector<8x128xf32> to vector<8x96xf32>
    %cst_49 = arith.constant 5.000000e-01 : f32
    %184 = vector.broadcast %cst_49 : f32 to vector<8x96xf32>
    %185 = arith.mulf %184, %183 : vector<8x96xf32>
    %cst_50 = arith.constant 5.000000e-01 : f32
    %186 = vector.broadcast %cst_50 : f32 to vector<8x96xf32>
    %187 = arith.addf %185, %186 : vector<8x96xf32>
    %188 = vector.extract_strided_slice %187 {offsets = [0, 0], sizes = [8, 32], strides = [1, 1]} : vector<8x96xf32> to vector<8x32xf32>
    %189 = vector.extract_strided_slice %187 {offsets = [0, 32], sizes = [8, 32], strides = [1, 1]} : vector<8x96xf32> to vector<8x32xf32>
    %190 = vector.extract_strided_slice %187 {offsets = [0, 64], sizes = [8, 32], strides = [1, 1]} : vector<8x96xf32> to vector<8x32xf32>
    %191 = vector.extract_strided_slice %182 {offsets = [0, 96], sizes = [8, 32], strides = [1, 1]} : vector<8x128xf32> to vector<8x32xf32>
    %192 = arith.mulf %189, %155 : vector<8x32xf32>
    %193 = arith.mulf %188, %191 : vector<8x32xf32>
    %194 = arith.addf %192, %193 : vector<8x32xf32>
    %195 = math.tanh %194 : vector<8x32xf32>
    %196 = arith.mulf %190, %195 : vector<8x32xf32>
    %cst_51 = arith.constant dense<0.000000e+00> : vector<8x128xf32>
    %197 = tpu.matmul %196, %3, %cst_51 {dimension_numbers = #tpu.dot_dimension_numbers<[1], [0], [0], [1], [0, 0, 1, 1], [], []>} : vector<8x32xf32>, vector<32x128xf32>, vector<8x128xf32> -> vector<8x128xf32>
    %198 = arith.addf %197, %178 : vector<8x128xf32>
    %199 = vector.broadcast %4 : vector<1x128xf32> to vector<8x128xf32>
    %200 = arith.addf %198, %199 : vector<8x128xf32>
    %201 = math.tanh %200 : vector<8x128xf32>
    %202 = vector.extract_strided_slice %201 {offsets = [0, 0], sizes = [8, 96], strides = [1, 1]} : vector<8x128xf32> to vector<8x96xf32>
    %cst_52 = arith.constant 5.000000e-01 : f32
    %203 = vector.broadcast %cst_52 : f32 to vector<8x96xf32>
    %204 = arith.mulf %203, %202 : vector<8x96xf32>
    %cst_53 = arith.constant 5.000000e-01 : f32
    %205 = vector.broadcast %cst_53 : f32 to vector<8x96xf32>
    %206 = arith.addf %204, %205 : vector<8x96xf32>
    %207 = vector.extract_strided_slice %206 {offsets = [0, 0], sizes = [8, 32], strides = [1, 1]} : vector<8x96xf32> to vector<8x32xf32>
    %208 = vector.extract_strided_slice %206 {offsets = [0, 32], sizes = [8, 32], strides = [1, 1]} : vector<8x96xf32> to vector<8x32xf32>
    %209 = vector.extract_strided_slice %206 {offsets = [0, 64], sizes = [8, 32], strides = [1, 1]} : vector<8x96xf32> to vector<8x32xf32>
    %210 = vector.extract_strided_slice %201 {offsets = [0, 96], sizes = [8, 32], strides = [1, 1]} : vector<8x128xf32> to vector<8x32xf32>
    %211 = arith.mulf %208, %174 : vector<8x32xf32>
    %212 = arith.mulf %207, %210 : vector<8x32xf32>
    %213 = arith.addf %211, %212 : vector<8x32xf32>
    %214 = math.tanh %213 : vector<8x32xf32>
    %215 = arith.mulf %209, %214 : vector<8x32xf32>
    %cst_54 = arith.constant dense<0.000000e+00> : vector<8x128xf32>
    %216 = tpu.matmul %196, %2, %cst_54 {dimension_numbers = #tpu.dot_dimension_numbers<[1], [0], [0], [1], [0, 0, 1, 1], [], []>} : vector<8x32xf32>, vector<32x128xf32>, vector<8x128xf32> -> vector<8x128xf32>
    %cst_55 = arith.constant dense<0.000000e+00> : vector<8x128xf32>
    %217 = tpu.matmul %215, %9, %cst_55 {dimension_numbers = #tpu.dot_dimension_numbers<[1], [0], [0], [1], [0, 0, 1, 1], [], []>} : vector<8x32xf32>, vector<32x128xf32>, vector<8x128xf32> -> vector<8x128xf32>
    %218 = vector.extract_strided_slice %19 {offsets = [5, 0, 0], sizes = [1, 8, 128], strides = [1, 1, 1]} : vector<8x8x128xf32> to vector<1x8x128xf32>
    %219 = vector.shape_cast %218 : vector<1x8x128xf32> to vector<8x128xf32>
    %220 = arith.addf %219, %216 : vector<8x128xf32>
    %221 = math.tanh %220 : vector<8x128xf32>
    %222 = vector.extract_strided_slice %221 {offsets = [0, 0], sizes = [8, 96], strides = [1, 1]} : vector<8x128xf32> to vector<8x96xf32>
    %cst_56 = arith.constant 5.000000e-01 : f32
    %223 = vector.broadcast %cst_56 : f32 to vector<8x96xf32>
    %224 = arith.mulf %223, %222 : vector<8x96xf32>
    %cst_57 = arith.constant 5.000000e-01 : f32
    %225 = vector.broadcast %cst_57 : f32 to vector<8x96xf32>
    %226 = arith.addf %224, %225 : vector<8x96xf32>
    %227 = vector.extract_strided_slice %226 {offsets = [0, 0], sizes = [8, 32], strides = [1, 1]} : vector<8x96xf32> to vector<8x32xf32>
    %228 = vector.extract_strided_slice %226 {offsets = [0, 32], sizes = [8, 32], strides = [1, 1]} : vector<8x96xf32> to vector<8x32xf32>
    %229 = vector.extract_strided_slice %226 {offsets = [0, 64], sizes = [8, 32], strides = [1, 1]} : vector<8x96xf32> to vector<8x32xf32>
    %230 = vector.extract_strided_slice %221 {offsets = [0, 96], sizes = [8, 32], strides = [1, 1]} : vector<8x128xf32> to vector<8x32xf32>
    %231 = arith.mulf %228, %194 : vector<8x32xf32>
    %232 = arith.mulf %227, %230 : vector<8x32xf32>
    %233 = arith.addf %231, %232 : vector<8x32xf32>
    %234 = math.tanh %233 : vector<8x32xf32>
    %235 = arith.mulf %229, %234 : vector<8x32xf32>
    %cst_58 = arith.constant dense<0.000000e+00> : vector<8x128xf32>
    %236 = tpu.matmul %235, %3, %cst_58 {dimension_numbers = #tpu.dot_dimension_numbers<[1], [0], [0], [1], [0, 0, 1, 1], [], []>} : vector<8x32xf32>, vector<32x128xf32>, vector<8x128xf32> -> vector<8x128xf32>
    %237 = arith.addf %236, %217 : vector<8x128xf32>
    %238 = vector.broadcast %4 : vector<1x128xf32> to vector<8x128xf32>
    %239 = arith.addf %237, %238 : vector<8x128xf32>
    %240 = math.tanh %239 : vector<8x128xf32>
    %241 = vector.extract_strided_slice %240 {offsets = [0, 0], sizes = [8, 96], strides = [1, 1]} : vector<8x128xf32> to vector<8x96xf32>
    %cst_59 = arith.constant 5.000000e-01 : f32
    %242 = vector.broadcast %cst_59 : f32 to vector<8x96xf32>
    %243 = arith.mulf %242, %241 : vector<8x96xf32>
    %cst_60 = arith.constant 5.000000e-01 : f32
    %244 = vector.broadcast %cst_60 : f32 to vector<8x96xf32>
    %245 = arith.addf %243, %244 : vector<8x96xf32>
    %246 = vector.extract_strided_slice %245 {offsets = [0, 0], sizes = [8, 32], strides = [1, 1]} : vector<8x96xf32> to vector<8x32xf32>
    %247 = vector.extract_strided_slice %245 {offsets = [0, 32], sizes = [8, 32], strides = [1, 1]} : vector<8x96xf32> to vector<8x32xf32>
    %248 = vector.extract_strided_slice %245 {offsets = [0, 64], sizes = [8, 32], strides = [1, 1]} : vector<8x96xf32> to vector<8x32xf32>
    %249 = vector.extract_strided_slice %240 {offsets = [0, 96], sizes = [8, 32], strides = [1, 1]} : vector<8x128xf32> to vector<8x32xf32>
    %250 = arith.mulf %247, %213 : vector<8x32xf32>
    %251 = arith.mulf %246, %249 : vector<8x32xf32>
    %252 = arith.addf %250, %251 : vector<8x32xf32>
    %253 = math.tanh %252 : vector<8x32xf32>
    %254 = arith.mulf %248, %253 : vector<8x32xf32>
    %cst_61 = arith.constant dense<0.000000e+00> : vector<8x128xf32>
    %255 = tpu.matmul %235, %2, %cst_61 {dimension_numbers = #tpu.dot_dimension_numbers<[1], [0], [0], [1], [0, 0, 1, 1], [], []>} : vector<8x32xf32>, vector<32x128xf32>, vector<8x128xf32> -> vector<8x128xf32>
    %cst_62 = arith.constant dense<0.000000e+00> : vector<8x128xf32>
    %256 = tpu.matmul %254, %9, %cst_62 {dimension_numbers = #tpu.dot_dimension_numbers<[1], [0], [0], [1], [0, 0, 1, 1], [], []>} : vector<8x32xf32>, vector<32x128xf32>, vector<8x128xf32> -> vector<8x128xf32>
    %257 = vector.extract_strided_slice %19 {offsets = [6, 0, 0], sizes = [1, 8, 128], strides = [1, 1, 1]} : vector<8x8x128xf32> to vector<1x8x128xf32>
    %258 = vector.shape_cast %257 : vector<1x8x128xf32> to vector<8x128xf32>
    %259 = arith.addf %258, %255 : vector<8x128xf32>
    %260 = math.tanh %259 : vector<8x128xf32>
    %261 = vector.extract_strided_slice %260 {offsets = [0, 0], sizes = [8, 96], strides = [1, 1]} : vector<8x128xf32> to vector<8x96xf32>
    %cst_63 = arith.constant 5.000000e-01 : f32
    %262 = vector.broadcast %cst_63 : f32 to vector<8x96xf32>
    %263 = arith.mulf %262, %261 : vector<8x96xf32>
    %cst_64 = arith.constant 5.000000e-01 : f32
    %264 = vector.broadcast %cst_64 : f32 to vector<8x96xf32>
    %265 = arith.addf %263, %264 : vector<8x96xf32>
    %266 = vector.extract_strided_slice %265 {offsets = [0, 0], sizes = [8, 32], strides = [1, 1]} : vector<8x96xf32> to vector<8x32xf32>
    %267 = vector.extract_strided_slice %265 {offsets = [0, 32], sizes = [8, 32], strides = [1, 1]} : vector<8x96xf32> to vector<8x32xf32>
    %268 = vector.extract_strided_slice %265 {offsets = [0, 64], sizes = [8, 32], strides = [1, 1]} : vector<8x96xf32> to vector<8x32xf32>
    %269 = vector.extract_strided_slice %260 {offsets = [0, 96], sizes = [8, 32], strides = [1, 1]} : vector<8x128xf32> to vector<8x32xf32>
    %270 = arith.mulf %267, %233 : vector<8x32xf32>
    %271 = arith.mulf %266, %269 : vector<8x32xf32>
    %272 = arith.addf %270, %271 : vector<8x32xf32>
    %273 = math.tanh %272 : vector<8x32xf32>
    %274 = arith.mulf %268, %273 : vector<8x32xf32>
    %cst_65 = arith.constant dense<0.000000e+00> : vector<8x128xf32>
    %275 = tpu.matmul %274, %3, %cst_65 {dimension_numbers = #tpu.dot_dimension_numbers<[1], [0], [0], [1], [0, 0, 1, 1], [], []>} : vector<8x32xf32>, vector<32x128xf32>, vector<8x128xf32> -> vector<8x128xf32>
    %276 = arith.addf %275, %256 : vector<8x128xf32>
    %277 = vector.broadcast %4 : vector<1x128xf32> to vector<8x128xf32>
    %278 = arith.addf %276, %277 : vector<8x128xf32>
    %279 = math.tanh %278 : vector<8x128xf32>
    %280 = vector.extract_strided_slice %279 {offsets = [0, 0], sizes = [8, 96], strides = [1, 1]} : vector<8x128xf32> to vector<8x96xf32>
    %cst_66 = arith.constant 5.000000e-01 : f32
    %281 = vector.broadcast %cst_66 : f32 to vector<8x96xf32>
    %282 = arith.mulf %281, %280 : vector<8x96xf32>
    %cst_67 = arith.constant 5.000000e-01 : f32
    %283 = vector.broadcast %cst_67 : f32 to vector<8x96xf32>
    %284 = arith.addf %282, %283 : vector<8x96xf32>
    %285 = vector.extract_strided_slice %284 {offsets = [0, 0], sizes = [8, 32], strides = [1, 1]} : vector<8x96xf32> to vector<8x32xf32>
    %286 = vector.extract_strided_slice %284 {offsets = [0, 32], sizes = [8, 32], strides = [1, 1]} : vector<8x96xf32> to vector<8x32xf32>
    %287 = vector.extract_strided_slice %284 {offsets = [0, 64], sizes = [8, 32], strides = [1, 1]} : vector<8x96xf32> to vector<8x32xf32>
    %288 = vector.extract_strided_slice %279 {offsets = [0, 96], sizes = [8, 32], strides = [1, 1]} : vector<8x128xf32> to vector<8x32xf32>
    %289 = arith.mulf %286, %252 : vector<8x32xf32>
    %290 = arith.mulf %285, %288 : vector<8x32xf32>
    %291 = arith.addf %289, %290 : vector<8x32xf32>
    %292 = math.tanh %291 : vector<8x32xf32>
    %293 = arith.mulf %287, %292 : vector<8x32xf32>
    %cst_68 = arith.constant dense<0.000000e+00> : vector<8x128xf32>
    %294 = tpu.matmul %274, %2, %cst_68 {dimension_numbers = #tpu.dot_dimension_numbers<[1], [0], [0], [1], [0, 0, 1, 1], [], []>} : vector<8x32xf32>, vector<32x128xf32>, vector<8x128xf32> -> vector<8x128xf32>
    %cst_69 = arith.constant dense<0.000000e+00> : vector<8x128xf32>
    %295 = tpu.matmul %293, %9, %cst_69 {dimension_numbers = #tpu.dot_dimension_numbers<[1], [0], [0], [1], [0, 0, 1, 1], [], []>} : vector<8x32xf32>, vector<32x128xf32>, vector<8x128xf32> -> vector<8x128xf32>
    %296 = vector.extract_strided_slice %19 {offsets = [7, 0, 0], sizes = [1, 8, 128], strides = [1, 1, 1]} : vector<8x8x128xf32> to vector<1x8x128xf32>
    %297 = vector.shape_cast %296 : vector<1x8x128xf32> to vector<8x128xf32>
    %298 = arith.addf %297, %294 : vector<8x128xf32>
    %299 = math.tanh %298 : vector<8x128xf32>
    %300 = vector.extract_strided_slice %299 {offsets = [0, 0], sizes = [8, 96], strides = [1, 1]} : vector<8x128xf32> to vector<8x96xf32>
    %cst_70 = arith.constant 5.000000e-01 : f32
    %301 = vector.broadcast %cst_70 : f32 to vector<8x96xf32>
    %302 = arith.mulf %301, %300 : vector<8x96xf32>
    %cst_71 = arith.constant 5.000000e-01 : f32
    %303 = vector.broadcast %cst_71 : f32 to vector<8x96xf32>
    %304 = arith.addf %302, %303 : vector<8x96xf32>
    %305 = vector.extract_strided_slice %304 {offsets = [0, 0], sizes = [8, 32], strides = [1, 1]} : vector<8x96xf32> to vector<8x32xf32>
    %306 = vector.extract_strided_slice %304 {offsets = [0, 32], sizes = [8, 32], strides = [1, 1]} : vector<8x96xf32> to vector<8x32xf32>
    %307 = vector.extract_strided_slice %304 {offsets = [0, 64], sizes = [8, 32], strides = [1, 1]} : vector<8x96xf32> to vector<8x32xf32>
    %308 = vector.extract_strided_slice %299 {offsets = [0, 96], sizes = [8, 32], strides = [1, 1]} : vector<8x128xf32> to vector<8x32xf32>
    %309 = arith.mulf %306, %272 : vector<8x32xf32>
    %310 = arith.mulf %305, %308 : vector<8x32xf32>
    %311 = arith.addf %309, %310 : vector<8x32xf32>
    %312 = math.tanh %311 : vector<8x32xf32>
    %313 = arith.mulf %307, %312 : vector<8x32xf32>
    %cst_72 = arith.constant dense<0.000000e+00> : vector<8x128xf32>
    %314 = tpu.matmul %313, %3, %cst_72 {dimension_numbers = #tpu.dot_dimension_numbers<[1], [0], [0], [1], [0, 0, 1, 1], [], []>} : vector<8x32xf32>, vector<32x128xf32>, vector<8x128xf32> -> vector<8x128xf32>
    %315 = arith.addf %314, %295 : vector<8x128xf32>
    %316 = vector.broadcast %4 : vector<1x128xf32> to vector<8x128xf32>
    %317 = arith.addf %315, %316 : vector<8x128xf32>
    %318 = math.tanh %317 : vector<8x128xf32>
    %319 = vector.extract_strided_slice %318 {offsets = [0, 0], sizes = [8, 96], strides = [1, 1]} : vector<8x128xf32> to vector<8x96xf32>
    %cst_73 = arith.constant 5.000000e-01 : f32
    %320 = vector.broadcast %cst_73 : f32 to vector<8x96xf32>
    %321 = arith.mulf %320, %319 : vector<8x96xf32>
    %cst_74 = arith.constant 5.000000e-01 : f32
    %322 = vector.broadcast %cst_74 : f32 to vector<8x96xf32>
    %323 = arith.addf %321, %322 : vector<8x96xf32>
    %324 = vector.extract_strided_slice %323 {offsets = [0, 0], sizes = [8, 32], strides = [1, 1]} : vector<8x96xf32> to vector<8x32xf32>
    %325 = vector.extract_strided_slice %323 {offsets = [0, 32], sizes = [8, 32], strides = [1, 1]} : vector<8x96xf32> to vector<8x32xf32>
    %326 = vector.extract_strided_slice %323 {offsets = [0, 64], sizes = [8, 32], strides = [1, 1]} : vector<8x96xf32> to vector<8x32xf32>
    %327 = vector.extract_strided_slice %318 {offsets = [0, 96], sizes = [8, 32], strides = [1, 1]} : vector<8x128xf32> to vector<8x32xf32>
    %328 = arith.mulf %325, %291 : vector<8x32xf32>
    %329 = arith.mulf %324, %327 : vector<8x32xf32>
    %330 = arith.addf %328, %329 : vector<8x32xf32>
    %331 = math.tanh %330 : vector<8x32xf32>
    %332 = arith.mulf %326, %331 : vector<8x32xf32>
    %cst_75 = arith.constant dense<0.000000e+00> : vector<8x128xf32>
    %333 = tpu.matmul %313, %2, %cst_75 {dimension_numbers = #tpu.dot_dimension_numbers<[1], [0], [0], [1], [0, 0, 1, 1], [], []>} : vector<8x32xf32>, vector<32x128xf32>, vector<8x128xf32> -> vector<8x128xf32>
    %cst_76 = arith.constant dense<0.000000e+00> : vector<8x256xf32>
    %334 = tpu.matmul %332, %5, %cst_76 {dimension_numbers = #tpu.dot_dimension_numbers<[1], [0], [0], [1], [0, 0, 1, 1], [], []>} : vector<8x32xf32>, vector<32x256xf32>, vector<8x256xf32> -> vector<8x256xf32>
    %335 = vector.extract_strided_slice %334 {offsets = [0, 0], sizes = [8, 128], strides = [1, 1]} : vector<8x256xf32> to vector<8x128xf32>
    %336 = arith.addf %333, %335 : vector<8x128xf32>
    %337 = vector.broadcast %6 : vector<1x128xf32> to vector<8x128xf32>
    %338 = arith.addf %336, %337 : vector<8x128xf32>
    %339 = math.tanh %338 : vector<8x128xf32>
    %340 = vector.extract_strided_slice %339 {offsets = [0, 0], sizes = [8, 96], strides = [1, 1]} : vector<8x128xf32> to vector<8x96xf32>
    %cst_77 = arith.constant 5.000000e-01 : f32
    %341 = vector.broadcast %cst_77 : f32 to vector<8x96xf32>
    %342 = arith.mulf %341, %340 : vector<8x96xf32>
    %cst_78 = arith.constant 5.000000e-01 : f32
    %343 = vector.broadcast %cst_78 : f32 to vector<8x96xf32>
    %344 = arith.addf %342, %343 : vector<8x96xf32>
    %345 = vector.extract_strided_slice %344 {offsets = [0, 0], sizes = [8, 32], strides = [1, 1]} : vector<8x96xf32> to vector<8x32xf32>
    %346 = vector.extract_strided_slice %344 {offsets = [0, 32], sizes = [8, 32], strides = [1, 1]} : vector<8x96xf32> to vector<8x32xf32>
    %347 = vector.extract_strided_slice %344 {offsets = [0, 64], sizes = [8, 32], strides = [1, 1]} : vector<8x96xf32> to vector<8x32xf32>
    %348 = vector.extract_strided_slice %339 {offsets = [0, 96], sizes = [8, 32], strides = [1, 1]} : vector<8x128xf32> to vector<8x32xf32>
    %349 = arith.mulf %346, %311 : vector<8x32xf32>
    %350 = arith.mulf %345, %348 : vector<8x32xf32>
    %351 = arith.addf %349, %350 : vector<8x32xf32>
    %352 = math.tanh %351 : vector<8x32xf32>
    %353 = arith.mulf %347, %352 : vector<8x32xf32>
    %cst_79 = arith.constant dense<0.000000e+00> : vector<8x128xf32>
    %354 = tpu.matmul %353, %3, %cst_79 {dimension_numbers = #tpu.dot_dimension_numbers<[1], [0], [0], [1], [0, 0, 1, 1], [], []>} : vector<8x32xf32>, vector<32x128xf32>, vector<8x128xf32> -> vector<8x128xf32>
    %355 = vector.extract_strided_slice %334 {offsets = [0, 128], sizes = [8, 128], strides = [1, 1]} : vector<8x256xf32> to vector<8x128xf32>
    %356 = arith.addf %354, %355 : vector<8x128xf32>
    %357 = vector.broadcast %4 : vector<1x128xf32> to vector<8x128xf32>
    %358 = arith.addf %356, %357 : vector<8x128xf32>
    %359 = math.tanh %358 : vector<8x128xf32>
    %360 = vector.extract_strided_slice %359 {offsets = [0, 0], sizes = [8, 96], strides = [1, 1]} : vector<8x128xf32> to vector<8x96xf32>
    %cst_80 = arith.constant 5.000000e-01 : f32
    %361 = vector.broadcast %cst_80 : f32 to vector<8x96xf32>
    %362 = arith.mulf %361, %360 : vector<8x96xf32>
    %cst_81 = arith.constant 5.000000e-01 : f32
    %363 = vector.broadcast %cst_81 : f32 to vector<8x96xf32>
    %364 = arith.addf %362, %363 : vector<8x96xf32>
    %365 = vector.extract_strided_slice %364 {offsets = [0, 0], sizes = [8, 32], strides = [1, 1]} : vector<8x96xf32> to vector<8x32xf32>
    %366 = vector.extract_strided_slice %364 {offsets = [0, 32], sizes = [8, 32], strides = [1, 1]} : vector<8x96xf32> to vector<8x32xf32>
    %367 = vector.extract_strided_slice %364 {offsets = [0, 64], sizes = [8, 32], strides = [1, 1]} : vector<8x96xf32> to vector<8x32xf32>
    %368 = vector.extract_strided_slice %359 {offsets = [0, 96], sizes = [8, 32], strides = [1, 1]} : vector<8x128xf32> to vector<8x32xf32>
    %369 = arith.mulf %366, %330 : vector<8x32xf32>
    %370 = arith.mulf %365, %368 : vector<8x32xf32>
    %371 = arith.addf %369, %370 : vector<8x32xf32>
    %372 = math.tanh %371 : vector<8x32xf32>
    %373 = arith.mulf %367, %372 : vector<8x32xf32>
    %cst_82 = arith.constant dense<0.000000e+00> : vector<8x128xf32>
    %374 = tpu.matmul %353, %2, %cst_82 {dimension_numbers = #tpu.dot_dimension_numbers<[1], [0], [0], [1], [0, 0, 1, 1], [], []>} : vector<8x32xf32>, vector<32x128xf32>, vector<8x128xf32> -> vector<8x128xf32>
    %cst_83 = arith.constant dense<0.000000e+00> : vector<8x256xf32>
    %375 = tpu.matmul %373, %5, %cst_83 {dimension_numbers = #tpu.dot_dimension_numbers<[1], [0], [0], [1], [0, 0, 1, 1], [], []>} : vector<8x32xf32>, vector<32x256xf32>, vector<8x256xf32> -> vector<8x256xf32>
    %376 = vector.extract_strided_slice %375 {offsets = [0, 0], sizes = [8, 128], strides = [1, 1]} : vector<8x256xf32> to vector<8x128xf32>
    %377 = arith.addf %374, %376 : vector<8x128xf32>
    %378 = vector.broadcast %6 : vector<1x128xf32> to vector<8x128xf32>
    %379 = arith.addf %377, %378 : vector<8x128xf32>
    %380 = math.tanh %379 : vector<8x128xf32>
    %381 = vector.extract_strided_slice %380 {offsets = [0, 0], sizes = [8, 96], strides = [1, 1]} : vector<8x128xf32> to vector<8x96xf32>
    %cst_84 = arith.constant 5.000000e-01 : f32
    %382 = vector.broadcast %cst_84 : f32 to vector<8x96xf32>
    %383 = arith.mulf %382, %381 : vector<8x96xf32>
    %cst_85 = arith.constant 5.000000e-01 : f32
    %384 = vector.broadcast %cst_85 : f32 to vector<8x96xf32>
    %385 = arith.addf %383, %384 : vector<8x96xf32>
    %386 = vector.extract_strided_slice %385 {offsets = [0, 0], sizes = [8, 32], strides = [1, 1]} : vector<8x96xf32> to vector<8x32xf32>
    %387 = vector.extract_strided_slice %385 {offsets = [0, 32], sizes = [8, 32], strides = [1, 1]} : vector<8x96xf32> to vector<8x32xf32>
    %388 = vector.extract_strided_slice %385 {offsets = [0, 64], sizes = [8, 32], strides = [1, 1]} : vector<8x96xf32> to vector<8x32xf32>
    %389 = vector.extract_strided_slice %380 {offsets = [0, 96], sizes = [8, 32], strides = [1, 1]} : vector<8x128xf32> to vector<8x32xf32>
    %390 = arith.mulf %387, %351 : vector<8x32xf32>
    %391 = arith.mulf %386, %389 : vector<8x32xf32>
    %392 = arith.addf %390, %391 : vector<8x32xf32>
    %393 = math.tanh %392 : vector<8x32xf32>
    %394 = arith.mulf %388, %393 : vector<8x32xf32>
    %cst_86 = arith.constant dense<0.000000e+00> : vector<8x128xf32>
    %395 = tpu.matmul %394, %3, %cst_86 {dimension_numbers = #tpu.dot_dimension_numbers<[1], [0], [0], [1], [0, 0, 1, 1], [], []>} : vector<8x32xf32>, vector<32x128xf32>, vector<8x128xf32> -> vector<8x128xf32>
    %396 = vector.extract_strided_slice %375 {offsets = [0, 128], sizes = [8, 128], strides = [1, 1]} : vector<8x256xf32> to vector<8x128xf32>
    %397 = arith.addf %395, %396 : vector<8x128xf32>
    %398 = vector.broadcast %4 : vector<1x128xf32> to vector<8x128xf32>
    %399 = arith.addf %397, %398 : vector<8x128xf32>
    %400 = math.tanh %399 : vector<8x128xf32>
    %401 = vector.extract_strided_slice %400 {offsets = [0, 0], sizes = [8, 96], strides = [1, 1]} : vector<8x128xf32> to vector<8x96xf32>
    %cst_87 = arith.constant 5.000000e-01 : f32
    %402 = vector.broadcast %cst_87 : f32 to vector<8x96xf32>
    %403 = arith.mulf %402, %401 : vector<8x96xf32>
    %cst_88 = arith.constant 5.000000e-01 : f32
    %404 = vector.broadcast %cst_88 : f32 to vector<8x96xf32>
    %405 = arith.addf %403, %404 : vector<8x96xf32>
    %406 = vector.extract_strided_slice %405 {offsets = [0, 0], sizes = [8, 32], strides = [1, 1]} : vector<8x96xf32> to vector<8x32xf32>
    %407 = vector.extract_strided_slice %405 {offsets = [0, 32], sizes = [8, 32], strides = [1, 1]} : vector<8x96xf32> to vector<8x32xf32>
    %408 = vector.extract_strided_slice %405 {offsets = [0, 64], sizes = [8, 32], strides = [1, 1]} : vector<8x96xf32> to vector<8x32xf32>
    %409 = vector.extract_strided_slice %400 {offsets = [0, 96], sizes = [8, 32], strides = [1, 1]} : vector<8x128xf32> to vector<8x32xf32>
    %410 = arith.mulf %407, %371 : vector<8x32xf32>
    %411 = arith.mulf %406, %409 : vector<8x32xf32>
    %412 = arith.addf %410, %411 : vector<8x32xf32>
    %413 = math.tanh %412 : vector<8x32xf32>
    %414 = arith.mulf %408, %413 : vector<8x32xf32>
    %cst_89 = arith.constant dense<0.000000e+00> : vector<8x128xf32>
    %415 = tpu.matmul %394, %2, %cst_89 {dimension_numbers = #tpu.dot_dimension_numbers<[1], [0], [0], [1], [0, 0, 1, 1], [], []>} : vector<8x32xf32>, vector<32x128xf32>, vector<8x128xf32> -> vector<8x128xf32>
    %cst_90 = arith.constant dense<0.000000e+00> : vector<8x256xf32>
    %416 = tpu.matmul %414, %5, %cst_90 {dimension_numbers = #tpu.dot_dimension_numbers<[1], [0], [0], [1], [0, 0, 1, 1], [], []>} : vector<8x32xf32>, vector<32x256xf32>, vector<8x256xf32> -> vector<8x256xf32>
    %417 = vector.extract_strided_slice %416 {offsets = [0, 0], sizes = [8, 128], strides = [1, 1]} : vector<8x256xf32> to vector<8x128xf32>
    %418 = arith.addf %415, %417 : vector<8x128xf32>
    %419 = vector.broadcast %6 : vector<1x128xf32> to vector<8x128xf32>
    %420 = arith.addf %418, %419 : vector<8x128xf32>
    %421 = math.tanh %420 : vector<8x128xf32>
    %422 = vector.extract_strided_slice %421 {offsets = [0, 0], sizes = [8, 96], strides = [1, 1]} : vector<8x128xf32> to vector<8x96xf32>
    %cst_91 = arith.constant 5.000000e-01 : f32
    %423 = vector.broadcast %cst_91 : f32 to vector<8x96xf32>
    %424 = arith.mulf %423, %422 : vector<8x96xf32>
    %cst_92 = arith.constant 5.000000e-01 : f32
    %425 = vector.broadcast %cst_92 : f32 to vector<8x96xf32>
    %426 = arith.addf %424, %425 : vector<8x96xf32>
    %427 = vector.extract_strided_slice %426 {offsets = [0, 0], sizes = [8, 32], strides = [1, 1]} : vector<8x96xf32> to vector<8x32xf32>
    %428 = vector.extract_strided_slice %426 {offsets = [0, 32], sizes = [8, 32], strides = [1, 1]} : vector<8x96xf32> to vector<8x32xf32>
    %429 = vector.extract_strided_slice %426 {offsets = [0, 64], sizes = [8, 32], strides = [1, 1]} : vector<8x96xf32> to vector<8x32xf32>
    %430 = vector.extract_strided_slice %421 {offsets = [0, 96], sizes = [8, 32], strides = [1, 1]} : vector<8x128xf32> to vector<8x32xf32>
    %431 = arith.mulf %428, %392 : vector<8x32xf32>
    %432 = arith.mulf %427, %430 : vector<8x32xf32>
    %433 = arith.addf %431, %432 : vector<8x32xf32>
    %434 = math.tanh %433 : vector<8x32xf32>
    %435 = arith.mulf %429, %434 : vector<8x32xf32>
    %cst_93 = arith.constant dense<0.000000e+00> : vector<8x128xf32>
    %436 = tpu.matmul %435, %3, %cst_93 {dimension_numbers = #tpu.dot_dimension_numbers<[1], [0], [0], [1], [0, 0, 1, 1], [], []>} : vector<8x32xf32>, vector<32x128xf32>, vector<8x128xf32> -> vector<8x128xf32>
    %437 = vector.extract_strided_slice %416 {offsets = [0, 128], sizes = [8, 128], strides = [1, 1]} : vector<8x256xf32> to vector<8x128xf32>
    %438 = arith.addf %436, %437 : vector<8x128xf32>
    %439 = vector.broadcast %4 : vector<1x128xf32> to vector<8x128xf32>
    %440 = arith.addf %438, %439 : vector<8x128xf32>
    %441 = math.tanh %440 : vector<8x128xf32>
    %442 = vector.extract_strided_slice %441 {offsets = [0, 0], sizes = [8, 96], strides = [1, 1]} : vector<8x128xf32> to vector<8x96xf32>
    %cst_94 = arith.constant 5.000000e-01 : f32
    %443 = vector.broadcast %cst_94 : f32 to vector<8x96xf32>
    %444 = arith.mulf %443, %442 : vector<8x96xf32>
    %cst_95 = arith.constant 5.000000e-01 : f32
    %445 = vector.broadcast %cst_95 : f32 to vector<8x96xf32>
    %446 = arith.addf %444, %445 : vector<8x96xf32>
    %447 = vector.extract_strided_slice %446 {offsets = [0, 0], sizes = [8, 32], strides = [1, 1]} : vector<8x96xf32> to vector<8x32xf32>
    %448 = vector.extract_strided_slice %446 {offsets = [0, 32], sizes = [8, 32], strides = [1, 1]} : vector<8x96xf32> to vector<8x32xf32>
    %449 = vector.extract_strided_slice %446 {offsets = [0, 64], sizes = [8, 32], strides = [1, 1]} : vector<8x96xf32> to vector<8x32xf32>
    %450 = vector.extract_strided_slice %441 {offsets = [0, 96], sizes = [8, 32], strides = [1, 1]} : vector<8x128xf32> to vector<8x32xf32>
    %451 = arith.mulf %448, %412 : vector<8x32xf32>
    %452 = arith.mulf %447, %450 : vector<8x32xf32>
    %453 = arith.addf %451, %452 : vector<8x32xf32>
    %454 = math.tanh %453 : vector<8x32xf32>
    %455 = arith.mulf %449, %454 : vector<8x32xf32>
    %cst_96 = arith.constant dense<0.000000e+00> : vector<8x128xf32>
    %456 = tpu.matmul %435, %2, %cst_96 {dimension_numbers = #tpu.dot_dimension_numbers<[1], [0], [0], [1], [0, 0, 1, 1], [], []>} : vector<8x32xf32>, vector<32x128xf32>, vector<8x128xf32> -> vector<8x128xf32>
    %cst_97 = arith.constant dense<0.000000e+00> : vector<8x256xf32>
    %457 = tpu.matmul %455, %5, %cst_97 {dimension_numbers = #tpu.dot_dimension_numbers<[1], [0], [0], [1], [0, 0, 1, 1], [], []>} : vector<8x32xf32>, vector<32x256xf32>, vector<8x256xf32> -> vector<8x256xf32>
    %458 = vector.extract_strided_slice %457 {offsets = [0, 0], sizes = [8, 128], strides = [1, 1]} : vector<8x256xf32> to vector<8x128xf32>
    %459 = arith.addf %456, %458 : vector<8x128xf32>
    %460 = vector.broadcast %6 : vector<1x128xf32> to vector<8x128xf32>
    %461 = arith.addf %459, %460 : vector<8x128xf32>
    %462 = math.tanh %461 : vector<8x128xf32>
    %463 = vector.extract_strided_slice %462 {offsets = [0, 0], sizes = [8, 96], strides = [1, 1]} : vector<8x128xf32> to vector<8x96xf32>
    %cst_98 = arith.constant 5.000000e-01 : f32
    %464 = vector.broadcast %cst_98 : f32 to vector<8x96xf32>
    %465 = arith.mulf %464, %463 : vector<8x96xf32>
    %cst_99 = arith.constant 5.000000e-01 : f32
    %466 = vector.broadcast %cst_99 : f32 to vector<8x96xf32>
    %467 = arith.addf %465, %466 : vector<8x96xf32>
    %468 = vector.extract_strided_slice %467 {offsets = [0, 0], sizes = [8, 32], strides = [1, 1]} : vector<8x96xf32> to vector<8x32xf32>
    %469 = vector.extract_strided_slice %467 {offsets = [0, 32], sizes = [8, 32], strides = [1, 1]} : vector<8x96xf32> to vector<8x32xf32>
    %470 = vector.extract_strided_slice %467 {offsets = [0, 64], sizes = [8, 32], strides = [1, 1]} : vector<8x96xf32> to vector<8x32xf32>
    %471 = vector.extract_strided_slice %462 {offsets = [0, 96], sizes = [8, 32], strides = [1, 1]} : vector<8x128xf32> to vector<8x32xf32>
    %472 = arith.mulf %469, %433 : vector<8x32xf32>
    %473 = arith.mulf %468, %471 : vector<8x32xf32>
    %474 = arith.addf %472, %473 : vector<8x32xf32>
    %475 = math.tanh %474 : vector<8x32xf32>
    %476 = arith.mulf %470, %475 : vector<8x32xf32>
    %cst_100 = arith.constant dense<0.000000e+00> : vector<8x128xf32>
    %477 = tpu.matmul %476, %3, %cst_100 {dimension_numbers = #tpu.dot_dimension_numbers<[1], [0], [0], [1], [0, 0, 1, 1], [], []>} : vector<8x32xf32>, vector<32x128xf32>, vector<8x128xf32> -> vector<8x128xf32>
    %478 = vector.extract_strided_slice %457 {offsets = [0, 128], sizes = [8, 128], strides = [1, 1]} : vector<8x256xf32> to vector<8x128xf32>
    %479 = arith.addf %477, %478 : vector<8x128xf32>
    %480 = vector.broadcast %4 : vector<1x128xf32> to vector<8x128xf32>
    %481 = arith.addf %479, %480 : vector<8x128xf32>
    %482 = math.tanh %481 : vector<8x128xf32>
    %483 = vector.extract_strided_slice %482 {offsets = [0, 0], sizes = [8, 96], strides = [1, 1]} : vector<8x128xf32> to vector<8x96xf32>
    %cst_101 = arith.constant 5.000000e-01 : f32
    %484 = vector.broadcast %cst_101 : f32 to vector<8x96xf32>
    %485 = arith.mulf %484, %483 : vector<8x96xf32>
    %cst_102 = arith.constant 5.000000e-01 : f32
    %486 = vector.broadcast %cst_102 : f32 to vector<8x96xf32>
    %487 = arith.addf %485, %486 : vector<8x96xf32>
    %488 = vector.extract_strided_slice %487 {offsets = [0, 0], sizes = [8, 32], strides = [1, 1]} : vector<8x96xf32> to vector<8x32xf32>
    %489 = vector.extract_strided_slice %487 {offsets = [0, 32], sizes = [8, 32], strides = [1, 1]} : vector<8x96xf32> to vector<8x32xf32>
    %490 = vector.extract_strided_slice %487 {offsets = [0, 64], sizes = [8, 32], strides = [1, 1]} : vector<8x96xf32> to vector<8x32xf32>
    %491 = vector.extract_strided_slice %482 {offsets = [0, 96], sizes = [8, 32], strides = [1, 1]} : vector<8x128xf32> to vector<8x32xf32>
    %492 = arith.mulf %489, %453 : vector<8x32xf32>
    %493 = arith.mulf %488, %491 : vector<8x32xf32>
    %494 = arith.addf %492, %493 : vector<8x32xf32>
    %495 = math.tanh %494 : vector<8x32xf32>
    %496 = arith.mulf %490, %495 : vector<8x32xf32>
    %497 = vector.broadcast %7 : vector<1x32xf32> to vector<8x32xf32>
    %498 = arith.mulf %59, %497 : vector<8x32xf32>
    %cst_103 = arith.constant dense<0.000000e+00> : vector<8xf32>
    %499 = vector.multi_reduction <add>, %498, %cst_103 [1] : vector<8x32xf32> to vector<8xf32>
    %500 = vector.shape_cast %499 : vector<8xf32> to vector<8x1xf32>
    %501 = vector.broadcast %7 : vector<1x32xf32> to vector<8x32xf32>
    %502 = arith.mulf %98, %501 : vector<8x32xf32>
    %cst_104 = arith.constant dense<0.000000e+00> : vector<8xf32>
    %503 = vector.multi_reduction <add>, %502, %cst_104 [1] : vector<8x32xf32> to vector<8xf32>
    %504 = vector.shape_cast %503 : vector<8xf32> to vector<8x1xf32>
    %505 = vector.broadcast %7 : vector<1x32xf32> to vector<8x32xf32>
    %506 = arith.mulf %137, %505 : vector<8x32xf32>
    %cst_105 = arith.constant dense<0.000000e+00> : vector<8xf32>
    %507 = vector.multi_reduction <add>, %506, %cst_105 [1] : vector<8x32xf32> to vector<8xf32>
    %508 = vector.shape_cast %507 : vector<8xf32> to vector<8x1xf32>
    %509 = vector.broadcast %7 : vector<1x32xf32> to vector<8x32xf32>
    %510 = arith.mulf %176, %509 : vector<8x32xf32>
    %cst_106 = arith.constant dense<0.000000e+00> : vector<8xf32>
    %511 = vector.multi_reduction <add>, %510, %cst_106 [1] : vector<8x32xf32> to vector<8xf32>
    %512 = vector.shape_cast %511 : vector<8xf32> to vector<8x1xf32>
    %513 = vector.broadcast %7 : vector<1x32xf32> to vector<8x32xf32>
    %514 = arith.mulf %215, %513 : vector<8x32xf32>
    %cst_107 = arith.constant dense<0.000000e+00> : vector<8xf32>
    %515 = vector.multi_reduction <add>, %514, %cst_107 [1] : vector<8x32xf32> to vector<8xf32>
    %516 = vector.shape_cast %515 : vector<8xf32> to vector<8x1xf32>
    %517 = vector.broadcast %7 : vector<1x32xf32> to vector<8x32xf32>
    %518 = arith.mulf %254, %517 : vector<8x32xf32>
    %cst_108 = arith.constant dense<0.000000e+00> : vector<8xf32>
    %519 = vector.multi_reduction <add>, %518, %cst_108 [1] : vector<8x32xf32> to vector<8xf32>
    %520 = vector.shape_cast %519 : vector<8xf32> to vector<8x1xf32>
    %521 = vector.broadcast %7 : vector<1x32xf32> to vector<8x32xf32>
    %522 = arith.mulf %293, %521 : vector<8x32xf32>
    %cst_109 = arith.constant dense<0.000000e+00> : vector<8xf32>
    %523 = vector.multi_reduction <add>, %522, %cst_109 [1] : vector<8x32xf32> to vector<8xf32>
    %524 = vector.shape_cast %523 : vector<8xf32> to vector<8x1xf32>
    %525 = vector.broadcast %7 : vector<1x32xf32> to vector<8x32xf32>
    %526 = arith.mulf %332, %525 : vector<8x32xf32>
    %cst_110 = arith.constant dense<0.000000e+00> : vector<8xf32>
    %527 = vector.multi_reduction <add>, %526, %cst_110 [1] : vector<8x32xf32> to vector<8xf32>
    %528 = vector.shape_cast %527 : vector<8xf32> to vector<8x1xf32>
    %529 = vector.broadcast %7 : vector<1x32xf32> to vector<8x32xf32>
    %530 = arith.mulf %373, %529 : vector<8x32xf32>
    %cst_111 = arith.constant dense<0.000000e+00> : vector<8xf32>
    %531 = vector.multi_reduction <add>, %530, %cst_111 [1] : vector<8x32xf32> to vector<8xf32>
    %532 = vector.shape_cast %531 : vector<8xf32> to vector<8x1xf32>
    %533 = vector.broadcast %7 : vector<1x32xf32> to vector<8x32xf32>
    %534 = arith.mulf %414, %533 : vector<8x32xf32>
    %cst_112 = arith.constant dense<0.000000e+00> : vector<8xf32>
    %535 = vector.multi_reduction <add>, %534, %cst_112 [1] : vector<8x32xf32> to vector<8xf32>
    %536 = vector.shape_cast %535 : vector<8xf32> to vector<8x1xf32>
    %537 = vector.broadcast %7 : vector<1x32xf32> to vector<8x32xf32>
    %538 = arith.mulf %455, %537 : vector<8x32xf32>
    %cst_113 = arith.constant dense<0.000000e+00> : vector<8xf32>
    %539 = vector.multi_reduction <add>, %538, %cst_113 [1] : vector<8x32xf32> to vector<8xf32>
    %540 = vector.shape_cast %539 : vector<8xf32> to vector<8x1xf32>
    %541 = vector.broadcast %7 : vector<1x32xf32> to vector<8x32xf32>
    %542 = arith.mulf %496, %541 : vector<8x32xf32>
    %cst_114 = arith.constant dense<0.000000e+00> : vector<8xf32>
    %543 = vector.multi_reduction <add>, %542, %cst_114 [1] : vector<8x32xf32> to vector<8xf32>
    %544 = vector.shape_cast %543 : vector<8xf32> to vector<8x1xf32>
    %545 = tpu.concatenate %500, %504, %508, %512, %516, %520, %524, %528, %532, %536, %540, %544 in 1 : vector<8x1xf32>, vector<8x1xf32>, vector<8x1xf32>, vector<8x1xf32>, vector<8x1xf32>, vector<8x1xf32>, vector<8x1xf32>, vector<8x1xf32>, vector<8x1xf32>, vector<8x1xf32>, vector<8x1xf32>, vector<8x1xf32> -> vector<8x12xf32>
    %546 = vector.broadcast %8 : vector<1x1xf32> to vector<8x12xf32>
    %547 = arith.addf %545, %546 : vector<8x12xf32>
    %c0_115 = arith.constant 0 : index
    %c0_116 = arith.constant 0 : index
    %548 = vector.load %arg11[%c0_115, %c0_116] : memref<8x12xf32, #tpu.memory_space<vmem>>, vector<8x12xf32>
    tpu.vector_store %arg11[%c0_115, %c0_116], %547 {strides = array<i32>} : memref<8x12xf32, #tpu.memory_space<vmem>>, vector<8x12xf32>,
    return
  }
  func.func @transform_0(%arg0: i32) -> (i32, i32) {
    %c0_i32 = arith.constant 0 : i32
    %c0_i32_0 = arith.constant 0 : i32
    return %arg0, %c0_i32 : i32, i32
  }
  func.func @transform_1(%arg0: i32) -> (i32, i32) {
    %c0_i32 = arith.constant 0 : i32
    %c0_i32_0 = arith.constant 0 : i32
    %c0_i32_1 = arith.constant 0 : i32
    return %c0_i32, %c0_i32_0 : i32, i32
  }
  func.func @transform_2(%arg0: i32) -> (i32, i32) {
    %c0_i32 = arith.constant 0 : i32
    %c0_i32_0 = arith.constant 0 : i32
    %c0_i32_1 = arith.constant 0 : i32
    return %c0_i32, %c0_i32_0 : i32, i32
  }
  func.func @transform_3(%arg0: i32) -> (i32, i32) {
    %c0_i32 = arith.constant 0 : i32
    %c0_i32_0 = arith.constant 0 : i32
    %c0_i32_1 = arith.constant 0 : i32
    return %c0_i32, %c0_i32_0 : i32, i32
  }
  func.func @transform_4(%arg0: i32) -> (i32, i32) {
    %c0_i32 = arith.constant 0 : i32
    %c0_i32_0 = arith.constant 0 : i32
    %c0_i32_1 = arith.constant 0 : i32
    return %c0_i32, %c0_i32_0 : i32, i32
  }
  func.func @transform_5(%arg0: i32) -> (i32, i32) {
    %c0_i32 = arith.constant 0 : i32
    %c0_i32_0 = arith.constant 0 : i32
    %c0_i32_1 = arith.constant 0 : i32
    return %c0_i32, %c0_i32_0 : i32, i32
  }
  func.func @transform_6(%arg0: i32) -> (i32, i32) {
    %c0_i32 = arith.constant 0 : i32
    %c0_i32_0 = arith.constant 0 : i32
    %c0_i32_1 = arith.constant 0 : i32
    return %c0_i32, %c0_i32_0 : i32, i32
  }
  func.func @transform_7(%arg0: i32) -> (i32, i32) {
    %c0_i32 = arith.constant 0 : i32
    %c0_i32_0 = arith.constant 0 : i32
    %c0_i32_1 = arith.constant 0 : i32
    return %c0_i32, %c0_i32_0 : i32, i32
  }
  func.func @transform_8(%arg0: i32) -> (i32, i32) {
    %c0_i32 = arith.constant 0 : i32
    %c0_i32_0 = arith.constant 0 : i32
    %c0_i32_1 = arith.constant 0 : i32
    return %c0_i32, %c0_i32_0 : i32, i32
  }
  func.func @transform_9(%arg0: i32) -> (i32, i32) {
    %c0_i32 = arith.constant 0 : i32
    %c0_i32_0 = arith.constant 0 : i32
    %c0_i32_1 = arith.constant 0 : i32
    return %c0_i32, %c0_i32_0 : i32, i32
  }
  func.func @transform_10(%arg0: i32) -> (i32, i32) {
    %c0_i32 = arith.constant 0 : i32
    %c0_i32_0 = arith.constant 0 : i32
    return %arg0, %c0_i32 : i32, i32
  }
}

</mosaic_0001>

<bundles_post_ra>
// kernel: tpu_custom_call.1
= control target key start
LH: loop header
LB: loop body
LE: loop exit
PB: predicated region body
PF: predicated region fallthrough
CT: control target
= control target key end

     0   :  { %s5216_s0 = inlined_call_operand.hbm [shape: f32[8,8], index: 0, kind: input, shape index: {}]   ;;  %s5217_s1 = inlined_call_operand.vmem [shape: f32[1,128], index: 1, kind: input, shape index: {}]   ;;  %s5218_s2 = inlined_call_operand.vmem [shape: f32[1,128], index: 2, kind: input, shape index: {}]   ;;  %s5219_s3 = inlined_call_operand.hbm [shape: f32[32,128], index: 3, kind: input, shape index: {}]   ;;  %s5220_s4 = inlined_call_operand.hbm [shape: f32[32,128], index: 4, kind: input, shape index: {}]   ;;  %s5221_s5 = inlined_call_operand.vmem [shape: f32[1,128], index: 5, kind: input, shape index: {}]   ;;  %s5222_s6 = inlined_call_operand.hbm [shape: f32[32,256], index: 6, kind: input, shape index: {}]   ;;  %s5223_s7 = inlined_call_operand.vmem [shape: f32[1,128], index: 7, kind: input, shape index: {}]   ;;  %s5224_s8 = inlined_call_operand.vmem [shape: f32[1,32], index: 8, kind: input, shape index: {}]   ;;  %s5225_s9 = inlined_call_operand.<no memory space> [shape: f32[1,1], index: 9, kind: input, shape index: {}]   ;;  %s5226_s10 = inlined_call_operand.hbm [shape: f32[8,12], index: 10, kind: output, shape index: {}]  }
   0x1   :  { %v15_v0 = vstv %s5225_s9 }
   0x2   :  { %16 = vst [vmem:[#allocation2] sm:$0x1] %v15_v0 }
   0x3   :  { %17 = vsyncpa [#allocation4], 0 }
   0x4   :  { %18 = vsyncpa [#allocation7], 0 }
   0x5   :  { %19 = vsyncpa [#allocation10], 0 }
   0x6   :  { %20 = vsyncpa [#allocation5], 0  ;;  %s4330_s15 = smov [#allocation6]  }
   0x7   :  { %s40_s16 = sshll.u32 %s4330_s15, 4  ;;  %s41_s16 = int_to_ptr.vmem [resolvable:$true] %s40_s16 }
   0x8   :  { %s4230_s17 = scalar_lea.vmem %s41_s16, 512  ;;  %p4235_p1 = scmp.lt.s32.totalorder %s41_s16, %s41_s16 }
   0x9   :  { %p4231_p0 = scmp.ne.s32.totalorder %s41_s16, %s4230_s17  ;;  %p4236_p2 = scmp.lt.s32.totalorder %s4230_s17, %s4230_s17 }
   0xb   :  { %p4237_p3 = por %p4236_p2, %p4235_p1 }
   0xd   :  { %p4238_p4 = pnand %p4237_p3, %p4231_p0 }
   0xf   :  { %4241 = shalt.err (!%p4238_p4)
}
  0x10   :  { %s4331_s18 = smov 128   ;;  %s4332_s19 = smov 8  }
  0x11   :  { %46 = dma.hbm_to_vmem [thread:$0]  %s5219_s3, 512, %s41_s16, [#allocation7], %s4331_s18, %s4331_s18, %s4332_s19  }
  0x12   :  { %s4333_s9 = smov [#allocation3]   ;;  %s4334_s23 = smov [#allocation8]  }
  0x13   :  { %s27_s22 = sshll.u32 %s4333_s9, 4  ;;  %s52_s24 = sshll.u32 %s4334_s23, 4  ;;  %s28_s22 = int_to_ptr.vmem [resolvable:$true] %s27_s22  ;;  %s53_s24 = int_to_ptr.vmem [resolvable:$true] %s52_s24 }
  0x14   :  { %s4250_s25 = scalar_lea.vmem %s28_s22, 128  ;;  %p4255_p6 = scmp.lt.s32.totalorder %s28_s22, %s28_s22 }
  0x15   :  { %p4251_p5 = scmp.ne.s32.totalorder %s28_s22, %s4250_s25  ;;  %p4256_p7 = scmp.lt.s32.totalorder %s4250_s25, %s4250_s25 }
  0x17   :  { %p4257_p8 = por %p4256_p7, %p4255_p6 }
  0x19   :  { %p4258_p9 = pnand %p4257_p8, %p4251_p5 }
  0x1b   :  { %4261 = shalt.err (!%p4258_p9)
}
  0x1c   :  { %30 = dma.hbm_to_vmem [thread:$0]  %s5216_s0, 128, %s28_s22, [#allocation4]  }
  0x1d   :  { %s4270_s28 = scalar_lea.vmem %s53_s24, 512  ;;  %p4275_p11 = scmp.lt.s32.totalorder %s53_s24, %s53_s24 }
  0x1e   :  { %p4271_p10 = scmp.ne.s32.totalorder %s53_s24, %s4270_s28  ;;  %p4276_p12 = scmp.lt.s32.totalorder %s4270_s28, %s4270_s28 }
  0x20   :  { %p4277_p13 = por %p4276_p12, %p4275_p11 }
  0x22   :  { %p4278_p0 = pnand %p4277_p13, %p4271_p10 }
  0x24   :  { %4281 = shalt.err (!%p4278_p0)
}
  0x25   :  { %58 = dma.hbm_to_vmem [thread:$0]  %s5220_s4, 512, %s53_s24, [#allocation7], %s4331_s18, %s4331_s18, %s4332_s19  }
  0x26   :  { %s4335_s30 = smov [#allocation9]  }
  0x27   :  { %s66_s11 = sshll.u32 %s4335_s30, 4  ;;  %s67_s11 = int_to_ptr.vmem [resolvable:$true] %s66_s11 }
  0x28   :  { %s4290_s12 = scalar_lea.vmem %s67_s11, 1024  ;;  %p4295_p2 = scmp.lt.s32.totalorder %s67_s11, %s67_s11 }
  0x29   :  { %p4291_p1 = scmp.ne.s32.totalorder %s67_s11, %s4290_s12  ;;  %p4296_p3 = scmp.lt.s32.totalorder %s4290_s12, %s4290_s12 }
  0x2b   :  { %p4297_p4 = por %p4296_p3, %p4295_p2 }
  0x2d   :  { %p4298_p5 = pnand %p4297_p4, %p4291_p1 }
  0x2f   :  { %4301 = shalt.err (!%p4298_p5)
}
  0x30   :  { %s4336_s0 = smov 256   ;;  %s4337_s13 = smov 16  }
  0x31   :  { %72 = dma.hbm_to_vmem [thread:$0]  %s5222_s6, 1024, %s67_s11, [#allocation10], %s4336_s0, %s4336_s0, %s4337_s13  }
  0x32   :  { %4322 = dma.done.wait [#allocation4], 128  }
  0x33   :  { %4323 = vsyncadd [#allocation4], 4294967168 }
  0x34   :  { %4324 = dma.done.wait [#allocation7], 1024  }
  0x35   :  { %4325 = vsyncadd [#allocation7], 4294966272 }
  0x36   :  { %4326 = dma.done.wait [#allocation10], 1024  }
  0x37   :  { %4327 = vsyncadd [#allocation10], 4294966272  ;;  %v4338_v1 = vmov 0.0   ;;  %vm4339_vm0 = vmmov 0   ;;  %v113_v2 = vld [vmem:[#allocation3] sm:$0xff]  ;;  %v4422_v4 = vld [vmem:[#allocation6 + $0x10] sm:$0xff]  ;;  %v146_v7 = vlaneseq }
  0x38   :  { %3744 = vmatprep.subr.mxu0 %v4338_v1  ;;  %3752 = vmatprep.mubr.msk.f32.mxu0 %vm4339_vm0, %v4338_v1  ;;  %v4420_v3 = vld [vmem:[#allocation6 + $0x18] sm:$0xff]  ;;  %v4426_v5 = vld [vmem:[#allocation6 + $0x8] sm:$0xff]  ;;  %v4430_v6 = vld [vmem:[#allocation6] sm:$0xff]  ;;  %s4340_s18 = smov 32   ;;  %s4341_s19 = smov 64   ;;  %vm230_vm1 = vcmask 261120  }
  0x39   :  { %3755 = vmatprep.subr.mxu1 %v4338_v1  ;;  %3763 = vmatprep.mubr.msk.f32.mxu1 %vm4339_vm0, %v4338_v1  ;;  %v4439_v8 = vshrl.u32 %v146_v7, 7  ;;  %v4448_v14 = vld [vmem:[%s5217_s1] ss:$0 sm:$0xff]  ;;  %v4462_v28 = vld [vmem:[#allocation9 + $0x38] sm:$0xff]  ;;  %v4464_v29 = vld [vmem:[#allocation9 + $0x28] sm:$0xff]  ;;  %vm3493_vm2 = vcmask 7168  }
  0x3a   :  { %114 = vxpose.xlu0.b32.start.end [1/1] (short) (narrow) %v113_v2, 8  ;;  %3745 = vmatpush3.msra.mxu0 %v4420_v3  ;;  %v4453_v16 = vld [vmem:[%s5218_s2] ss:$0 sm:$0xff]  ;;  %v4467_v30 = vld [vmem:[#allocation8 + $0x18] sm:$0xff]  ;;  %v4477_v33 = vld [vmem:[#allocation8 + $0x8] sm:$0xff]  ;;  %vm3495_vm3 = vcmask 15360  }
  0x3b   :  { %3746 = vmatprep.subr.mxu0 %v4338_v1  ;;  %v148_v9 = vsub.s32 0, %v4439_v8  ;;  %3756 = vmatpush3.msra.mxu1 %v4462_v28  ;;  %v4469_v31 = vld [vmem:[#allocation8 + $0x10] sm:$0xff]  ;;  %v4472_v32 = vld [vmem:[#allocation9 + $0x18] sm:$0xff]  ;;  %v4480_v34 = vld [vmem:[#allocation9 + $0x8] sm:$0xff]  ;;  %v155_v39 = vsub.s32 1, %v4439_v8  ;;  %vm3497_vm4 = vcmask 23552  }
  0x3c   :  { %3747 = vmatpush3.msra.mxu0 %v4422_v4  ;;  %3757 = vmatprep.subr.mxu1 %v4338_v1  ;;  %v4489_v36 = vld [vmem:[#allocation8] sm:$0xff]  ;;  %v4535_v46 = vld [vmem:[%s5221_s5] ss:$0 sm:$0xff]  ;;  %vm3499_vm5 = vcmask 31744   ;;  %vm3501_vm6 = vcmask 39936   ;;  %vm3503_vm7 = vcmask 48128  }
  0x3d   :  { %3748 = vmatprep.subr.mxu0 %v4338_v1  ;;  %3758 = vmatpush3.msra.mxu1 %v4464_v29  ;;  %vm3505_vm8 = vcmask 56320   ;;  %vm3507_vm9 = vcmask 64512   ;;  %vm3509_vm10 = vcmask 72704   ;;  %vm3511_vm11 = vcmask 80896  }
  0x3e   :  { %3749 = vmatpush3.msra.mxu0 %v4426_v5  ;;  %3759 = vmatprep.subr.mxu1 %v4338_v1  ;;  %vm3513_vm12 = vcmask 89088   ;;  %vm3525_vm13 = vcmask 97280  }
  0x3f   :  { %3750 = vmatprep.subr.mxu0 %v4338_v1  ;;  %3760 = vmatpush3.msra.mxu1 %v4472_v32 }
  0x40   :  { %3751 = vmatpush3.msra.mxu0 %v4430_v6  ;;  %3761 = vmatprep.subr.mxu1 %v4338_v1 }
  0x41   :  { %3753 = vmatmul.mubr.f32.vlgmr.msra.gmra.mxu0 %v4338_v1  ;;  %3766 = vmatprep.subr.mxu0 %v4338_v1 }
  0x42   :  { %3774 = vmatprep.mubr.msk.f32.mxu0 %vm4339_vm0, %v4338_v1  ;;  %3767 = vmatpush3.msra.mxu0 %v4467_v30 }
  0x43   :  { %3768 = vmatprep.subr.mxu0 %v4338_v1  ;;  %3762 = vmatpush3.msra.mxu1 %v4480_v34 }
  0x44   :  { %3769 = vmatpush3.msra.mxu0 %v4469_v31  ;;  %3777 = vmatprep.subr.mxu1 %v4338_v1 }
  0x45   :  { %3770 = vmatprep.subr.mxu0 %v4338_v1  ;;  %3764 = vmatmul.mubr.f32.vlgmr.msra.gmra.mxu1 %v4338_v1 }
  0x46   :  { %3771 = vmatpush3.msra.mxu0 %v4477_v33  ;;  %3778 = vmatpush3.msra.mxu1 %v4420_v3 }
  0x47   :  { %3772 = vmatprep.subr.mxu0 %v4338_v1  ;;  %3779 = vmatprep.subr.mxu1 %v4338_v1 }
  0x48   :  { %3773 = vmatpush3.msra.mxu0 %v4489_v36  ;;  %3780 = vmatpush3.msra.mxu1 %v4422_v4 }
  0x49   :  { %3785 = vmatprep.mubr.msk.f32.mxu1 %vm4339_vm0, %v4338_v1  ;;  %3781 = vmatprep.subr.mxu1 %v4338_v1 }
  0x4a   :  { %3788 = vmatprep.subr.mxu0 %v4338_v1  ;;  %3782 = vmatpush3.msra.mxu1 %v4426_v5 }
  0x4b   :  { %3783 = vmatprep.subr.mxu1 %v4338_v1 }
  0x4c   :  { %3784 = vmatpush3.msra.mxu1 %v4430_v6 }
  0x4d   :  { %3799 = vmatprep.subr.mxu1 %v4338_v1 }
  0xb6   :  { %v4442_v10 = vpop.trf.xlu0 }
  0xb7   :  { %v149_v11 = vrot.slane %v4442_v10, %v148_v9  ;;  %v156_v40 = vrot.slane %v4442_v10, %v155_v39 }
  0xb9   :  { %151 = vbcast.lane.b32.xlu0 %v149_v11, 256 }
 0x101   :  { %v300_v12 = vpop.f32.mrf.mxu0 }
 0x103   :  { %v3754_v13 = vpop.f32.mrf.mxu0 }
 0x105   :  { %v370_v41 = vpop.f32.mrf.mxu1 }
 0x107   :  { %v3765_v42 = vpop.f32.mrf.mxu1 }
 0x12b   :  { %v152_v15 = vpop.permute.xlu0 %151 }
 0x12c   :  { %v208_v17 = vmul.f32 %v4448_v14, %v152_v15 }
 0x12e   :  { %v222_v18 = vadd.f32 %v4453_v16, %v208_v17 }
 0x130   :  { %v374_v19 = vadd.f32 %v300_v12, %v222_v18 }
 0x132   :  { %4111 = vtanh.f32 %v374_v19 }
 0x13f   :  { %v4112_v20 = vpop.eup %4111 }
 0x140   :  { %380 = vrot.lane.b32.xlu1 %v4112_v20, %s4340_s18  ;;  %v376_v21 = vmul.f32 0.5, %v4112_v20  ;;  %v162_v20 = vsub.s32 2, %v4439_v8 }
 0x142   :  { %v377_v22 = vadd.f32 0.5, %v376_v21 }
 0x144   :  { %v378_v25 = vmul.f32 0.0, %v377_v22 }
 0x1b2   :  { %v381_v23 = vpop.permute.xlu1 %380 }
 0x1b3   :  { %v383_v24 = vmul.f32 %v381_v23, %v377_v22  ;;  %v163_v23 = vrot.slane %v4442_v10, %v162_v20 }
 0x1b5   :  { %385 = vrot.lane.b32.xlu1 %v383_v24, %s4340_s18 }
 0x227   :  { %v386_v26 = vpop.permute.xlu1 %385 }
 0x228   :  { %v4459_v27 = vadd.f32 %v386_v26, %v378_v25 }
 0x22a   :  { %4113 = vtanh.f32 %v4459_v27 }
 0x237   :  { %v4114_v35 = vpop.eup %4113 }
 0x238   :  { %391 = vrot.lane.b32.xlu1 %v4114_v35, %s4340_s18 }
 0x2aa   :  { %v392_v37 = vpop.permute.xlu1 %391 }
 0x2ab   :  { %v394_v38 = vmul.f32 %v392_v37, %v377_v22 }
 0x2ad   :  { %396 = vrot.lane.b32.xlu1 %v394_v38, %s4341_s19 }
 0x2b1   :  { %158 = vbcast.lane.b32.xlu1 %v156_v40, 256 }
 0x31f   :  { %v397_v43 = vpop.permute.xlu1 %396 }
 0x320   :  { %3775 = vmatmul.mubr.msk.f32.vlgmr.msra.gmra.mxu0 %vm230_vm1, %v397_v43  ;;  %3786 = vmatmul.mubr.msk.f32.vlgmr.msra.gmra.mxu1 %vm230_vm1, %v397_v43 }
 0x321   :  { %3789 = vmatpush3.msra.mxu0 %v4462_v28  ;;  %3800 = vmatpush3.msra.mxu1 %v4467_v30 }
 0x322   :  { %3790 = vmatprep.subr.mxu0 %v4338_v1  ;;  %3801 = vmatprep.subr.mxu1 %v4338_v1 }
 0x323   :  { %3791 = vmatpush3.msra.mxu0 %v4464_v29  ;;  %3796 = vmatprep.mubr.msk.f32.mxu0 %vm4339_vm0, %v4338_v1  ;;  %v159_v44 = vpop.permute.xlu1 %158 }
 0x324   :  { %3792 = vmatprep.subr.mxu0 %v4338_v1  ;;  %3802 = vmatpush3.msra.mxu1 %v4469_v31  ;;  %v209_v45 = vmul.f32 %v4448_v14, %v159_v44 }
 0x325   :  { %3793 = vmatpush3.msra.mxu0 %v4472_v32  ;;  %3803 = vmatprep.subr.mxu1 %v4338_v1 }
 0x326   :  { %3794 = vmatprep.subr.mxu0 %v4338_v1  ;;  %3804 = vmatpush3.msra.mxu1 %v4477_v33  ;;  %v223_v53 = vadd.f32 %v4453_v16, %v209_v45 }
 0x327   :  { %3795 = vmatpush3.msra.mxu0 %v4480_v34  ;;  %3805 = vmatprep.subr.mxu1 %v4338_v1 }
 0x328   :  { %3810 = vmatprep.subr.mxu0 %v4338_v1  ;;  %3806 = vmatpush3.msra.mxu1 %v4489_v36 }
 0x329   :  { %3807 = vmatprep.mubr.msk.f32.mxu1 %vm4339_vm0, %v4338_v1  ;;  %3821 = vmatprep.subr.mxu1 %v4338_v1 }
 0x3e0   :  { %v466_v47 = vpop.f32.mrf.mxu0  ;;  %v563_v48 = vpop.f32.mrf.mxu1 }
 0x3e1   :  { %v467_v49 = vadd.f32 %v466_v47, %v370_v41  ;;  %v642_v54 = vadd.f32 %v563_v48, %v223_v53 }
 0x3e2   :  { %v3776_v50 = vpop.f32.mrf.mxu0  ;;  %v3787_v51 = vpop.f32.mrf.mxu1 }
 0x3e3   :  { %v476_v52 = vadd.f32 %v4535_v46, %v467_v49 }
 0x3e5   :  { %4115 = vtanh.f32 %v476_v52 }
 0x3e6   :  { %4117 = vtanh.f32 %v642_v54 }
 0x3f2   :  { %v4116_v55 = vpop.eup %4115 }
 0x3f3   :  { %482 = vrot.lane.b32.xlu1 %v4116_v55, %s4340_s18  ;;  %v4118_v56 = vpop.eup %4117  ;;  %v478_v57 = vmul.f32 0.5, %v4116_v55 }
 0x3f4   :  { %v644_v59 = vmul.f32 0.5, %v4118_v56 }
 0x3f5   :  { %v479_v58 = vadd.f32 0.5, %v478_v57 }
 0x3f6   :  { %v645_v62 = vadd.f32 0.5, %v644_v59 }
 0x3f7   :  { %648 = vrot.lane.b32.xlu1 %v4118_v56, %s4340_s18  ;;  %v480_v2 = vmul.f32 0.0, %v479_v58 }
 0x3f8   :  { %v646_v11 = vmul.f32 %v645_v62, %v4459_v27 }
 0x465   :  { %v483_v60 = vpop.permute.xlu1 %482 }
 0x466   :  { %v485_v61 = vmul.f32 %v483_v60, %v479_v58 }
 0x468   :  { %487 = vrot.lane.b32.xlu1 %v485_v61, %s4340_s18 }
 0x469   :  { %v649_v63 = vpop.permute.xlu1 %648 }
 0x46a   :  { %v651_v0 = vmul.f32 %v649_v63, %v645_v62 }
 0x46c   :  { %653 = vrot.lane.b32.xlu1 %v651_v0, %s4340_s18 }
 0x4da   :  { %v488_v7 = vpop.permute.xlu1 %487 }
 0x4db   :  { %v4543_v9 = vadd.f32 %v488_v7, %v480_v2 }
 0x4dd   :  { %4119 = vtanh.f32 %v4543_v9 }
 0x4de   :  { %v654_v12 = vpop.permute.xlu1 %653 }
 0x4df   :  { %v4547_v13 = vadd.f32 %v654_v12, %v646_v11 }
 0x4e1   :  { %4121 = vtanh.f32 %v4547_v13 }
 0x4ea   :  { %v4120_v15 = vpop.eup %4119 }
 0x4eb   :  { %493 = vrot.lane.b32.xlu1 %v4120_v15, %s4340_s18 }
 0x4ee   :  { %v4122_v17 = vpop.eup %4121 }
 0x4ef   :  { %659 = vrot.lane.b32.xlu1 %v4122_v17, %s4340_s18 }
 0x55d   :  { %v494_v18 = vpop.permute.xlu1 %493 }
 0x55e   :  { %v4552_v19 = vmul.f32 %v494_v18, %v479_v58 }
 0x560   :  { %568 = vrot.lane.b32.xlu1 %v4552_v19, %s4341_s19 }
 0x561   :  { %v660_v21 = vpop.permute.xlu1 %659 }
 0x562   :  { %v662_v22 = vmul.f32 %v660_v21, %v645_v62 }
 0x564   :  { %165 = vbcast.lane.b32.xlu1 %v163_v23, 256  ;;  %664 = vrot.lane.b32.xlu0 %v662_v22, %s4341_s19 }
 0x5d2   :  { %v569_v24 = vpop.permute.xlu1 %568 }
 0x5d3   :  { %3797 = vmatmul.mubr.msk.f32.vlgmr.msra.gmra.mxu0 %vm230_vm1, %v569_v24 }
 0x5d4   :  { %3811 = vmatpush3.msra.mxu0 %v4420_v3  ;;  %3818 = vmatprep.mubr.msk.f32.mxu0 %vm4339_vm0, %v4338_v1 }
 0x5d5   :  { %3812 = vmatprep.subr.mxu0 %v4338_v1 }
 0x5d6   :  { %3813 = vmatpush3.msra.mxu0 %v4422_v4  ;;  %v665_v25 = vpop.permute.xlu0 %664  ;;  %v166_v26 = vpop.permute.xlu1 %165 }
 0x5d7   :  { %3814 = vmatprep.subr.mxu0 %v4338_v1  ;;  %3808 = vmatmul.mubr.msk.f32.vlgmr.msra.gmra.mxu1 %vm230_vm1, %v665_v25  ;;  %v210_v37 = vmul.f32 %v4448_v14, %v166_v26 }
 0x5d8   :  { %3815 = vmatpush3.msra.mxu0 %v4426_v5  ;;  %3822 = vmatpush3.msra.mxu1 %v4462_v28 }
 0x5d9   :  { %3816 = vmatprep.subr.mxu0 %v4338_v1  ;;  %3823 = vmatprep.subr.mxu1 %v4338_v1  ;;  %v224_v42 = vadd.f32 %v4453_v16, %v210_v37 }
 0x5da   :  { %3817 = vmatpush3.msra.mxu0 %v4430_v6  ;;  %3824 = vmatpush3.msra.mxu1 %v4464_v29 }
 0x5db   :  { %3819 = vmatmul.mubr.msk.f32.vlgmr.msra.gmra.mxu0 %vm230_vm1, %v665_v25  ;;  %3832 = vmatprep.subr.mxu0 %v4338_v1 }
 0x5dc   :  { %3833 = vmatpush3.msra.mxu0 %v4467_v30  ;;  %3825 = vmatprep.subr.mxu1 %v4338_v1 }
 0x5dd   :  { %3834 = vmatprep.subr.mxu0 %v4338_v1  ;;  %3826 = vmatpush3.msra.mxu1 %v4472_v32 }
 0x5de   :  { %3835 = vmatpush3.msra.mxu0 %v4469_v31  ;;  %3827 = vmatprep.subr.mxu1 %v4338_v1 }
 0x5df   :  { %3836 = vmatprep.subr.mxu0 %v4338_v1  ;;  %3828 = vmatpush3.msra.mxu1 %v4480_v34 }
 0x5e0   :  { %3837 = vmatpush3.msra.mxu0 %v4477_v33  ;;  %3829 = vmatprep.mubr.msk.f32.mxu1 %vm4339_vm0, %v4338_v1 }
 0x5e1   :  { %3838 = vmatprep.subr.mxu0 %v4338_v1  ;;  %3843 = vmatprep.subr.mxu1 %v4338_v1 }
 0x5e2   :  { %3839 = vmatpush3.msra.mxu0 %v4489_v36  ;;  %3840 = vmatprep.mubr.msk.f32.mxu0 %vm4339_vm0, %v4338_v1 }
 0x5e3   :  { %3854 = vmatprep.subr.mxu0 %v4338_v1 }
 0x693   :  { %v638_v27 = vpop.f32.mrf.mxu0 }
 0x695   :  { %v3798_v35 = vpop.f32.mrf.mxu0 }
 0x697   :  { %v734_v38 = vpop.f32.mrf.mxu1 }
 0x698   :  { %v735_v39 = vadd.f32 %v734_v38, %v638_v27 }
 0x699   :  { %v3809_v40 = vpop.f32.mrf.mxu1 }
 0x69a   :  { %v738_v41 = vadd.f32 %v4535_v46, %v735_v39 }
 0x69b   :  { %v825_v43 = vpop.f32.mrf.mxu0 }
 0x69c   :  { %4123 = vtanh.f32 %v738_v41  ;;  %v904_v44 = vadd.f32 %v825_v43, %v224_v42 }
 0x69d   :  { %v3820_v45 = vpop.f32.mrf.mxu0 }
 0x69e   :  { %4125 = vtanh.f32 %v904_v44 }
 0x6a9   :  { %v4124_v47 = vpop.eup %4123 }
 0x6aa   :  { %744 = vrot.lane.b32.xlu0 %v4124_v47, %s4340_s18  ;;  %v740_v49 = vmul.f32 0.5, %v4124_v47 }
 0x6ab   :  { %v4126_v48 = vpop.eup %4125 }
 0x6ac   :  { %910 = vrot.lane.b32.xlu1 %v4126_v48, %s4340_s18  ;;  %v906_v50 = vmul.f32 0.5, %v4126_v48  ;;  %v741_v51 = vadd.f32 0.5, %v740_v49 }
 0x6ae   :  { %v907_v54 = vadd.f32 0.5, %v906_v50  ;;  %v742_v57 = vmul.f32 %v741_v51, %v4543_v9  ;;  %v169_v9 = vsub.s32 3, %v4439_v8 }
 0x6b0   :  { %v908_v60 = vmul.f32 %v907_v54, %v4547_v13  ;;  %v170_v13 = vrot.slane %v4442_v10, %v169_v9 }
 0x71c   :  { %v745_v52 = vpop.permute.xlu0 %744 }
 0x71d   :  { %v747_v53 = vmul.f32 %v745_v52, %v741_v51 }
 0x71e   :  { %v911_v55 = vpop.permute.xlu1 %910 }
 0x71f   :  { %v913_v56 = vmul.f32 %v911_v55, %v907_v54  ;;  %749 = vrot.lane.b32.xlu0 %v747_v53, %s4340_s18 }
 0x721   :  { %915 = vrot.lane.b32.xlu1 %v913_v56, %s4340_s18 }
 0x791   :  { %v750_v58 = vpop.permute.xlu0 %749 }
 0x792   :  { %v4600_v59 = vadd.f32 %v750_v58, %v742_v57 }
 0x793   :  { %v916_v61 = vpop.permute.xlu1 %915 }
 0x794   :  { %4127 = vtanh.f32 %v4600_v59  ;;  %v4604_v62 = vadd.f32 %v916_v61, %v908_v60  ;;  %v176_v60 = vsub.s32 4, %v4439_v8 }
 0x796   :  { %4129 = vtanh.f32 %v4604_v62 }
 0x7a1   :  { %v4128_v63 = vpop.eup %4127 }
 0x7a2   :  { %755 = vrot.lane.b32.xlu0 %v4128_v63, %s4340_s18  ;;  %v177_v63 = vrot.slane %v4442_v10, %v176_v60 }
 0x7a3   :  { %v4130_v0 = vpop.eup %4129 }
 0x7a4   :  { %921 = vrot.lane.b32.xlu1 %v4130_v0, %s4340_s18 }
 0x814   :  { %v756_v2 = vpop.permute.xlu0 %755 }
 0x815   :  { %v4609_v7 = vmul.f32 %v756_v2, %v741_v51 }
 0x816   :  { %v922_v11 = vpop.permute.xlu1 %921 }
 0x817   :  { %v924_v12 = vmul.f32 %v922_v11, %v907_v54  ;;  %830 = vrot.lane.b32.xlu0 %v4609_v7, %s4341_s19 }
 0x819   :  { %926 = vrot.lane.b32.xlu1 %v924_v12, %s4341_s19 }
 0x81b   :  { %172 = vbcast.lane.b32.xlu0 %v170_v13, 256 }
 0x889   :  { %v831_v15 = vpop.permute.xlu0 %830 }
 0x88a   :  { %3830 = vmatmul.mubr.msk.f32.vlgmr.msra.gmra.mxu1 %vm230_vm1, %v831_v15 }
 0x88b   :  { %3844 = vmatpush3.msra.mxu1 %v4420_v3  ;;  %v927_v17 = vpop.permute.xlu1 %926  ;;  %3851 = vmatprep.mubr.msk.f32.mxu1 %vm4339_vm0, %v4338_v1 }
 0x88c   :  { %3841 = vmatmul.mubr.msk.f32.vlgmr.msra.gmra.mxu0 %vm230_vm1, %v927_v17  ;;  %3845 = vmatprep.subr.mxu1 %v4338_v1 }
 0x88d   :  { %3846 = vmatpush3.msra.mxu1 %v4422_v4  ;;  %3855 = vmatpush3.msra.mxu0 %v4462_v28  ;;  %v173_v18 = vpop.permute.xlu0 %172 }
 0x88e   :  { %3847 = vmatprep.subr.mxu1 %v4338_v1  ;;  %3856 = vmatprep.subr.mxu0 %v4338_v1  ;;  %v211_v23 = vmul.f32 %v4448_v14, %v173_v18 }
 0x88f   :  { %3848 = vmatpush3.msra.mxu1 %v4426_v5  ;;  %3857 = vmatpush3.msra.mxu0 %v4464_v29 }
 0x890   :  { %3849 = vmatprep.subr.mxu1 %v4338_v1  ;;  %3858 = vmatprep.subr.mxu0 %v4338_v1  ;;  %v225_v27 = vadd.f32 %v4453_v16, %v211_v23 }
 0x891   :  { %3850 = vmatpush3.msra.mxu1 %v4430_v6  ;;  %3859 = vmatpush3.msra.mxu0 %v4472_v32 }
 0x892   :  { %3852 = vmatmul.mubr.msk.f32.vlgmr.msra.gmra.mxu1 %vm230_vm1, %v927_v17  ;;  %3865 = vmatprep.subr.mxu1 %v4338_v1 }
 0x893   :  { %3860 = vmatprep.subr.mxu0 %v4338_v1  ;;  %3866 = vmatpush3.msra.mxu1 %v4467_v30 }
 0x894   :  { %3861 = vmatpush3.msra.mxu0 %v4480_v34  ;;  %3867 = vmatprep.subr.mxu1 %v4338_v1 }
 0x895   :  { %3862 = vmatprep.mubr.msk.f32.mxu0 %vm4339_vm0, %v4338_v1  ;;  %3868 = vmatpush3.msra.mxu1 %v4469_v31 }
 0x896   :  { %3876 = vmatprep.subr.mxu0 %v4338_v1  ;;  %3869 = vmatprep.subr.mxu1 %v4338_v1 }
 0x897   :  { %3870 = vmatpush3.msra.mxu1 %v4477_v33  ;;  %3873 = vmatprep.mubr.msk.f32.mxu1 %vm4339_vm0, %v4338_v1 }
 0x898   :  { %3871 = vmatprep.subr.mxu1 %v4338_v1 }
 0x899   :  { %3872 = vmatpush3.msra.mxu1 %v4489_v36 }
 0x89a   :  { %3887 = vmatprep.subr.mxu1 %v4338_v1 }
 0x94a   :  { %v900_v20 = vpop.f32.mrf.mxu1 }
 0x94c   :  { %v996_v21 = vpop.f32.mrf.mxu0  ;;  %v3831_v22 = vpop.f32.mrf.mxu1 }
 0x94d   :  { %v997_v24 = vadd.f32 %v996_v21, %v900_v20 }
 0x94e   :  { %v3842_v25 = vpop.f32.mrf.mxu0 }
 0x94f   :  { %v1000_v26 = vadd.f32 %v4535_v46, %v997_v24 }
 0x951   :  { %4131 = vtanh.f32 %v1000_v26 }
 0x952   :  { %v1087_v35 = vpop.f32.mrf.mxu1 }
 0x953   :  { %v1166_v37 = vadd.f32 %v1087_v35, %v225_v27 }
 0x954   :  { %v3853_v38 = vpop.f32.mrf.mxu1 }
 0x955   :  { %4133 = vtanh.f32 %v1166_v37 }
 0x95e   :  { %v4132_v39 = vpop.eup %4131 }
 0x95f   :  { %1006 = vrot.lane.b32.xlu1 %v4132_v39, %s4340_s18  ;;  %v1002_v41 = vmul.f32 0.5, %v4132_v39 }
 0x961   :  { %v1003_v42 = vadd.f32 0.5, %v1002_v41 }
 0x962   :  { %v4134_v40 = vpop.eup %4133 }
 0x963   :  { %1172 = vrot.lane.b32.xlu0 %v4134_v40, %s4340_s18  ;;  %v1168_v43 = vmul.f32 0.5, %v4134_v40  ;;  %v1004_v50 = vmul.f32 %v1003_v42, %v4600_v59 }
 0x965   :  { %v1169_v47 = vadd.f32 0.5, %v1168_v43 }
 0x967   :  { %v1170_v53 = vmul.f32 %v1169_v47, %v4604_v62 }
 0x9d1   :  { %v1007_v44 = vpop.permute.xlu1 %1006 }
 0x9d2   :  { %v1009_v45 = vmul.f32 %v1007_v44, %v1003_v42 }
 0x9d4   :  { %1011 = vrot.lane.b32.xlu1 %v1009_v45, %s4340_s18 }
 0x9d5   :  { %v1173_v48 = vpop.permute.xlu0 %1172 }
 0x9d6   :  { %v1175_v49 = vmul.f32 %v1173_v48, %v1169_v47 }
 0x9d8   :  { %1177 = vrot.lane.b32.xlu0 %v1175_v49, %s4340_s18 }
 0xa46   :  { %v1012_v51 = vpop.permute.xlu1 %1011 }
 0xa47   :  { %v4657_v52 = vadd.f32 %v1012_v51, %v1004_v50 }
 0xa49   :  { %4135 = vtanh.f32 %v4657_v52 }
 0xa4a   :  { %v1178_v54 = vpop.permute.xlu0 %1177 }
 0xa4b   :  { %v4661_v55 = vadd.f32 %v1178_v54, %v1170_v53  ;;  %v183_v54 = vsub.s32 5, %v4439_v8 }
 0xa4d   :  { %4137 = vtanh.f32 %v4661_v55 }
 0xa56   :  { %v4136_v56 = vpop.eup %4135 }
 0xa57   :  { %1017 = vrot.lane.b32.xlu1 %v4136_v56, %s4340_s18 }
 0xa5a   :  { %v4138_v57 = vpop.eup %4137 }
 0xa5b   :  { %1183 = vrot.lane.b32.xlu0 %v4138_v57, %s4340_s18  ;;  %v184_v57 = vrot.slane %v4442_v10, %v183_v54 }
 0xac9   :  { %v1018_v58 = vpop.permute.xlu1 %1017 }
 0xaca   :  { %v4666_v59 = vmul.f32 %v1018_v58, %v1003_v42 }
 0xacc   :  { %1092 = vrot.lane.b32.xlu1 %v4666_v59, %s4341_s19 }
 0xacd   :  { %v1184_v61 = vpop.permute.xlu0 %1183 }
 0xace   :  { %v1186_v62 = vmul.f32 %v1184_v61, %v1169_v47 }
 0xad0   :  { %1188 = vrot.lane.b32.xlu0 %v1186_v62, %s4341_s19  ;;  %179 = vbcast.lane.b32.xlu1 %v177_v63, 256 }
 0xb3e   :  { %v1093_v0 = vpop.permute.xlu1 %1092 }
 0xb3f   :  { %3863 = vmatmul.mubr.msk.f32.vlgmr.msra.gmra.mxu0 %vm230_vm1, %v1093_v0 }
 0xb40   :  { %3877 = vmatpush3.msra.mxu0 %v4420_v3  ;;  %3884 = vmatprep.mubr.msk.f32.mxu0 %vm4339_vm0, %v4338_v1 }
 0xb41   :  { %3878 = vmatprep.subr.mxu0 %v4338_v1 }
 0xb42   :  { %3879 = vmatpush3.msra.mxu0 %v4422_v4  ;;  %v1189_v2 = vpop.permute.xlu0 %1188  ;;  %v180_v9 = vpop.permute.xlu1 %179 }
 0xb43   :  { %3880 = vmatprep.subr.mxu0 %v4338_v1  ;;  %3874 = vmatmul.mubr.msk.f32.vlgmr.msra.gmra.mxu1 %vm230_vm1, %v1189_v2  ;;  %v212_v13 = vmul.f32 %v4448_v14, %v180_v9 }
 0xb44   :  { %3881 = vmatpush3.msra.mxu0 %v4426_v5  ;;  %3888 = vmatpush3.msra.mxu1 %v4462_v28 }
 0xb45   :  { %3882 = vmatprep.subr.mxu0 %v4338_v1  ;;  %3889 = vmatprep.subr.mxu1 %v4338_v1  ;;  %v226_v21 = vadd.f32 %v4453_v16, %v212_v13 }
 0xb46   :  { %3883 = vmatpush3.msra.mxu0 %v4430_v6  ;;  %3890 = vmatpush3.msra.mxu1 %v4464_v29 }
 0xb47   :  { %3885 = vmatmul.mubr.msk.f32.vlgmr.msra.gmra.mxu0 %vm230_vm1, %v1189_v2  ;;  %3898 = vmatprep.subr.mxu0 %v4338_v1 }
 0xb48   :  { %3899 = vmatpush3.msra.mxu0 %v4467_v30  ;;  %3891 = vmatprep.subr.mxu1 %v4338_v1 }
 0xb49   :  { %3900 = vmatprep.subr.mxu0 %v4338_v1  ;;  %3892 = vmatpush3.msra.mxu1 %v4472_v32 }
 0xb4a   :  { %3901 = vmatpush3.msra.mxu0 %v4469_v31  ;;  %3893 = vmatprep.subr.mxu1 %v4338_v1 }
 0xb4b   :  { %3902 = vmatprep.subr.mxu0 %v4338_v1  ;;  %3894 = vmatpush3.msra.mxu1 %v4480_v34 }
 0xb4c   :  { %3903 = vmatpush3.msra.mxu0 %v4477_v33  ;;  %3895 = vmatprep.mubr.msk.f32.mxu1 %vm4339_vm0, %v4338_v1 }
 0xb4d   :  { %3904 = vmatprep.subr.mxu0 %v4338_v1  ;;  %3909 = vmatprep.subr.mxu1 %v4338_v1 }
 0xb4e   :  { %3905 = vmatpush3.msra.mxu0 %v4489_v36  ;;  %3906 = vmatprep.mubr.msk.f32.mxu0 %vm4339_vm0, %v4338_v1 }
 0xb4f   :  { %3920 = vmatprep.subr.mxu0 %v4338_v1 }
 0xbff   :  { %v1162_v11 = vpop.f32.mrf.mxu0 }
 0xc01   :  { %v3864_v12 = vpop.f32.mrf.mxu0 }
 0xc03   :  { %v1258_v15 = vpop.f32.mrf.mxu1 }
 0xc04   :  { %v1259_v17 = vadd.f32 %v1258_v15, %v1162_v11 }
 0xc05   :  { %v3875_v18 = vpop.f32.mrf.mxu1 }
 0xc06   :  { %v1262_v20 = vadd.f32 %v4535_v46, %v1259_v17 }
 0xc07   :  { %v1349_v22 = vpop.f32.mrf.mxu0 }
 0xc08   :  { %4139 = vtanh.f32 %v1262_v20  ;;  %v1428_v23 = vadd.f32 %v1349_v22, %v226_v21 }
 0xc09   :  { %v3886_v24 = vpop.f32.mrf.mxu0 }
 0xc0a   :  { %4141 = vtanh.f32 %v1428_v23 }
 0xc15   :  { %v4140_v25 = vpop.eup %4139 }
 0xc16   :  { %1268 = vrot.lane.b32.xlu0 %v4140_v25, %s4340_s18  ;;  %v1264_v27 = vmul.f32 0.5, %v4140_v25 }
 0xc17   :  { %v4142_v26 = vpop.eup %4141 }
 0xc18   :  { %1434 = vrot.lane.b32.xlu1 %v4142_v26, %s4340_s18  ;;  %v1430_v35 = vmul.f32 0.5, %v4142_v26  ;;  %v1265_v37 = vadd.f32 0.5, %v1264_v27 }
 0xc1a   :  { %v1431_v40 = vadd.f32 0.5, %v1430_v35  ;;  %v1266_v43 = vmul.f32 %v1265_v37, %v4657_v52 }
 0xc1c   :  { %v1432_v47 = vmul.f32 %v1431_v40, %v4661_v55 }
 0xc88   :  { %v1269_v38 = vpop.permute.xlu0 %1268 }
 0xc89   :  { %v1271_v39 = vmul.f32 %v1269_v38, %v1265_v37 }
 0xc8a   :  { %v1435_v41 = vpop.permute.xlu1 %1434 }
 0xc8b   :  { %v1437_v42 = vmul.f32 %v1435_v41, %v1431_v40  ;;  %1273 = vrot.lane.b32.xlu0 %v1271_v39, %s4340_s18 }
 0xc8d   :  { %1439 = vrot.lane.b32.xlu1 %v1437_v42, %s4340_s18 }
 0xcfd   :  { %v1274_v44 = vpop.permute.xlu0 %1273 }
 0xcfe   :  { %v4714_v45 = vadd.f32 %v1274_v44, %v1266_v43 }
 0xcff   :  { %v1440_v48 = vpop.permute.xlu1 %1439 }
 0xd00   :  { %4143 = vtanh.f32 %v4714_v45  ;;  %v4718_v49 = vadd.f32 %v1440_v48, %v1432_v47 }
 0xd02   :  { %4145 = vtanh.f32 %v4718_v49 }
 0xd0d   :  { %v4144_v50 = vpop.eup %4143 }
 0xd0e   :  { %1279 = vrot.lane.b32.xlu0 %v4144_v50, %s4340_s18  ;;  %v190_v50 = vsub.s32 6, %v4439_v8 }
 0xd0f   :  { %v4146_v51 = vpop.eup %4145 }
 0xd10   :  { %1445 = vrot.lane.b32.xlu1 %v4146_v51, %s4340_s18 }
 0xd80   :  { %v1280_v53 = vpop.permute.xlu0 %1279 }
 0xd81   :  { %v4723_v52 = vmul.f32 %v1280_v53, %v1265_v37  ;;  %v191_v53 = vrot.slane %v4442_v10, %v190_v50 }
 0xd82   :  { %v1446_v56 = vpop.permute.xlu1 %1445 }
 0xd83   :  { %v1448_v55 = vmul.f32 %v1446_v56, %v1431_v40  ;;  %1354 = vrot.lane.b32.xlu0 %v4723_v52, %s4341_s19 }
 0xd85   :  { %1450 = vrot.lane.b32.xlu1 %v1448_v55, %s4341_s19 }
 0xd87   :  { %186 = vbcast.lane.b32.xlu0 %v184_v57, 256 }
 0xdf5   :  { %v1355_v58 = vpop.permute.xlu0 %1354 }
 0xdf6   :  { %3896 = vmatmul.mubr.msk.f32.vlgmr.msra.gmra.mxu1 %vm230_vm1, %v1355_v58 }
 0xdf7   :  { %3910 = vmatpush3.msra.mxu1 %v4420_v3  ;;  %v1451_v60 = vpop.permute.xlu1 %1450  ;;  %3917 = vmatprep.mubr.msk.f32.mxu1 %vm4339_vm0, %v4338_v1 }
 0xdf8   :  { %3907 = vmatmul.mubr.msk.f32.vlgmr.msra.gmra.mxu0 %vm230_vm1, %v1451_v60  ;;  %3911 = vmatprep.subr.mxu1 %v4338_v1 }
 0xdf9   :  { %3912 = vmatpush3.msra.mxu1 %v4422_v4  ;;  %3921 = vmatpush3.msra.mxu0 %v4462_v28  ;;  %v187_v61 = vpop.permute.xlu0 %186 }
 0xdfa   :  { %3913 = vmatprep.subr.mxu1 %v4338_v1  ;;  %3922 = vmatprep.subr.mxu0 %v4338_v1  ;;  %v213_v2 = vmul.f32 %v4448_v14, %v187_v61 }
 0xdfb   :  { %3914 = vmatpush3.msra.mxu1 %v4426_v5  ;;  %3923 = vmatpush3.msra.mxu0 %v4464_v29 }
 0xdfc   :  { %3915 = vmatprep.subr.mxu1 %v4338_v1  ;;  %3924 = vmatprep.subr.mxu0 %v4338_v1  ;;  %v227_v13 = vadd.f32 %v4453_v16, %v213_v2 }
 0xdfd   :  { %3916 = vmatpush3.msra.mxu1 %v4430_v6  ;;  %3925 = vmatpush3.msra.mxu0 %v4472_v32 }
 0xdfe   :  { %3918 = vmatmul.mubr.msk.f32.vlgmr.msra.gmra.mxu1 %vm230_vm1, %v1451_v60  ;;  %3931 = vmatprep.subr.mxu1 %v4338_v1 }
 0xdff   :  { %3926 = vmatprep.subr.mxu0 %v4338_v1  ;;  %3932 = vmatpush3.msra.mxu1 %v4467_v30 }
 0xe00   :  { %3927 = vmatpush3.msra.mxu0 %v4480_v34  ;;  %3933 = vmatprep.subr.mxu1 %v4338_v1 }
 0xe01   :  { %3928 = vmatprep.mubr.msk.f32.mxu0 %vm4339_vm0, %v4338_v1  ;;  %3934 = vmatpush3.msra.mxu1 %v4469_v31 }
 0xe02   :  { %3942 = vmatprep.subr.mxu0 %v4338_v1  ;;  %3935 = vmatprep.subr.mxu1 %v4338_v1 }
 0xe03   :  { %3936 = vmatpush3.msra.mxu1 %v4477_v33  ;;  %3939 = vmatprep.mubr.msk.f32.mxu1 %vm4339_vm0, %v4338_v1 }
 0xe04   :  { %3937 = vmatprep.subr.mxu1 %v4338_v1 }
 0xe05   :  { %3938 = vmatpush3.msra.mxu1 %v4489_v36 }
 0xe06   :  { %3953 = vmatprep.subr.mxu1 %v4338_v1 }
 0xeb6   :  { %v1424_v62 = vpop.f32.mrf.mxu1 }
 0xeb8   :  { %v1520_v63 = vpop.f32.mrf.mxu0  ;;  %v3897_v0 = vpop.f32.mrf.mxu1 }
 0xeb9   :  { %v1521_v9 = vadd.f32 %v1520_v63, %v1424_v62 }
 0xeba   :  { %v3908_v11 = vpop.f32.mrf.mxu0 }
 0xebb   :  { %v1524_v12 = vadd.f32 %v4535_v46, %v1521_v9 }
 0xebd   :  { %4147 = vtanh.f32 %v1524_v12 }
 0xebe   :  { %v1611_v15 = vpop.f32.mrf.mxu1 }
 0xebf   :  { %v1690_v17 = vadd.f32 %v1611_v15, %v227_v13 }
 0xec0   :  { %v3919_v18 = vpop.f32.mrf.mxu1 }
 0xec1   :  { %4149 = vtanh.f32 %v1690_v17 }
 0xeca   :  { %v4148_v20 = vpop.eup %4147 }
 0xecb   :  { %1530 = vrot.lane.b32.xlu1 %v4148_v20, %s4340_s18  ;;  %v1526_v22 = vmul.f32 0.5, %v4148_v20 }
 0xecd   :  { %v1527_v23 = vadd.f32 0.5, %v1526_v22  ;;  %v197_v22 = vsub.s32 7, %v4439_v8  ;;  %v4852_v8 = vld [vmem:[#allocation6 + $0x10] sm:$0xff] }
 0xece   :  { %v4150_v21 = vpop.eup %4149 }
 0xecf   :  { %1696 = vrot.lane.b32.xlu0 %v4150_v21, %s4340_s18  ;;  %v1692_v24 = vmul.f32 0.5, %v4150_v21  ;;  %v1528_v38 = vmul.f32 %v1527_v23, %v4714_v45 }
 0xed1   :  { %v1693_v27 = vadd.f32 0.5, %v1692_v24 }
 0xed3   :  { %v1694_v41 = vmul.f32 %v1693_v27, %v4718_v49 }
 0xf3d   :  { %v1531_v25 = vpop.permute.xlu1 %1530 }
 0xf3e   :  { %v1533_v26 = vmul.f32 %v1531_v25, %v1527_v23  ;;  %v198_v25 = vrot.slane %v4442_v10, %v197_v22  ;;  %v4855_v10 = vld [vmem:[#allocation9 + $0x38] sm:$0xff] }
 0xf40   :  { %1535 = vrot.lane.b32.xlu1 %v1533_v26, %s4340_s18 }
 0xf41   :  { %v1697_v35 = vpop.permute.xlu0 %1696 }
 0xf42   :  { %v1699_v37 = vmul.f32 %v1697_v35, %v1693_v27 }
 0xf44   :  { %1701 = vrot.lane.b32.xlu0 %v1699_v37, %s4340_s18  ;;  %v4860_v37 = vld [vmem:[#allocation6 + $0x8] sm:$0xff] }
 0xfb2   :  { %v1536_v39 = vpop.permute.xlu1 %1535 }
 0xfb3   :  { %v4771_v40 = vadd.f32 %v1536_v39, %v1528_v38  ;;  %v4863_v38 = vld [vmem:[#allocation9 + $0x28] sm:$0xff]  ;;  %v4868_v39 = vld [vmem:[#allocation6] sm:$0xff] }
 0xfb5   :  { %4151 = vtanh.f32 %v4771_v40 }
 0xfb6   :  { %v1702_v42 = vpop.permute.xlu0 %1701 }
 0xfb7   :  { %v4775_v43 = vadd.f32 %v1702_v42, %v1694_v41  ;;  %v4876_v41 = vld [vmem:[#allocation8 + $0x18] sm:$0xff]  ;;  %v4881_v42 = vld [vmem:[#allocation9 + $0x8] sm:$0xff] }
 0xfb9   :  { %4153 = vtanh.f32 %v4775_v43 }
 0xfc2   :  { %v4152_v44 = vpop.eup %4151 }
 0xfc3   :  { %1541 = vrot.lane.b32.xlu1 %v4152_v44, %s4340_s18  ;;  %v4892_v44 = vld [vmem:[#allocation8 + $0x8] sm:$0xff] }
 0xfc6   :  { %v4154_v47 = vpop.eup %4153 }
 0xfc7   :  { %1707 = vrot.lane.b32.xlu0 %v4154_v47, %s4340_s18  ;;  %v4897_v47 = vld [vmem:[#allocation8] sm:$0xff] }
0x1035   :  { %v1542_v48 = vpop.permute.xlu1 %1541 }
0x1036   :  { %v4780_v45 = vmul.f32 %v1542_v48, %v1527_v23 }
0x1038   :  { %1616 = vrot.lane.b32.xlu1 %v4780_v45, %s4341_s19 }
0x1039   :  { %v1708_v49 = vpop.permute.xlu0 %1707 }
0x103a   :  { %v1710_v51 = vmul.f32 %v1708_v49, %v1693_v27  ;;  %v4845_v27 = vld [vmem:[#allocation6 + $0x18] sm:$0xff] }
0x103c   :  { %1712 = vrot.lane.b32.xlu0 %v1710_v51, %s4341_s19  ;;  %193 = vbcast.lane.b32.xlu1 %v191_v53, 256  ;;  %v4219_v53 = vld [vmem:[%s5217_s1] ss:$0 sm:$0xff] }
0x10aa   :  { %v1617_v54 = vpop.permute.xlu1 %1616 }
0x10ab   :  { %3929 = vmatmul.mubr.msk.f32.vlgmr.msra.gmra.mxu0 %vm230_vm1, %v1617_v54 }
0x10ac   :  { %3943 = vmatpush3.msra.mxu0 %v4420_v3  ;;  %3950 = vmatprep.mubr.msk.f32.mxu0 %vm4339_vm0, %v4338_v1 }
0x10ad   :  { %3944 = vmatprep.subr.mxu0 %v4338_v1 }
0x10ae   :  { %3945 = vmatpush3.msra.mxu0 %v4422_v4  ;;  %v1713_v56 = vpop.permute.xlu0 %1712  ;;  %v194_v3 = vpop.permute.xlu1 %193 }
0x10af   :  { %3946 = vmatprep.subr.mxu0 %v4338_v1  ;;  %3940 = vmatmul.mubr.msk.f32.vlgmr.msra.gmra.mxu1 %vm230_vm1, %v1713_v56 }
0x10b0   :  { %3947 = vmatpush3.msra.mxu0 %v4426_v5  ;;  %3954 = vmatpush3.msra.mxu1 %v4462_v28 }
0x10b1   :  { %3948 = vmatprep.subr.mxu0 %v4338_v1  ;;  %3955 = vmatprep.subr.mxu1 %v4338_v1 }
0x10b2   :  { %3949 = vmatpush3.msra.mxu0 %v4430_v6  ;;  %3956 = vmatpush3.msra.mxu1 %v4464_v29  ;;  %v214_v6 = vmul.f32 %v4448_v14, %v194_v3 }
0x10b3   :  { %3951 = vmatmul.mubr.msk.f32.vlgmr.msra.gmra.mxu0 %vm230_vm1, %v1713_v56  ;;  %3964 = vmatprep.subr.mxu0 %v4338_v1 }
0x10b4   :  { %3965 = vmatpush3.msra.mxu0 %v4467_v30  ;;  %3957 = vmatprep.subr.mxu1 %v4338_v1 }
0x10b5   :  { %3966 = vmatprep.subr.mxu0 %v4338_v1  ;;  %3958 = vmatpush3.msra.mxu1 %v4472_v32  ;;  %v228_v32 = vadd.f32 %v4453_v16, %v214_v6 }
0x10b6   :  { %3967 = vmatpush3.msra.mxu0 %v4469_v31  ;;  %3959 = vmatprep.subr.mxu1 %v4338_v1 }
0x10b7   :  { %3968 = vmatprep.subr.mxu0 %v4338_v1  ;;  %3960 = vmatpush3.msra.mxu1 %v4480_v34 }
0x10b8   :  { %3969 = vmatpush3.msra.mxu0 %v4477_v33  ;;  %3961 = vmatprep.mubr.msk.f32.mxu1 %vm4339_vm0, %v4338_v1 }
0x10b9   :  { %3970 = vmatprep.subr.mxu0 %v4338_v1  ;;  %3975 = vmatprep.subr.mxu1 %v4338_v1 }
0x10ba   :  { %3971 = vmatpush3.msra.mxu0 %v4489_v36  ;;  %3972 = vmatprep.mubr.msk.f32.mxu0 %vm4339_vm0, %v4338_v1 }
0x10bb   :  { %3986 = vmatprep.subr.mxu0 %v4338_v1 }
0x116b   :  { %v1686_v4 = vpop.f32.mrf.mxu0 }
0x116d   :  { %v3930_v5 = vpop.f32.mrf.mxu0 }
0x116e   :  { %v4220_v5 = vld [vmem:[%s5218_s2] ss:$0 sm:$0xff] }
0x116f   :  { %v1782_v28 = vpop.f32.mrf.mxu1 }
0x1170   :  { %v1783_v29 = vadd.f32 %v1782_v28, %v1686_v4 }
0x1171   :  { %v3941_v30 = vpop.f32.mrf.mxu1 }
0x1172   :  { %v1786_v31 = vadd.f32 %v4535_v46, %v1783_v29 }
0x1173   :  { %v1873_v33 = vpop.f32.mrf.mxu0 }
0x1174   :  { %4155 = vtanh.f32 %v1786_v31  ;;  %v1952_v34 = vadd.f32 %v1873_v33, %v228_v32 }
0x1175   :  { %v3952_v36 = vpop.f32.mrf.mxu0 }
0x1176   :  { %4157 = vtanh.f32 %v1952_v34 }
0x1181   :  { %v4156_v55 = vpop.eup %4155 }
0x1182   :  { %1792 = vrot.lane.b32.xlu0 %v4156_v55, %s4340_s18  ;;  %v1788_v58 = vmul.f32 0.5, %v4156_v55 }
0x1183   :  { %v4158_v57 = vpop.eup %4157 }
0x1184   :  { %1958 = vrot.lane.b32.xlu1 %v4158_v57, %s4340_s18  ;;  %v1954_v14 = vmul.f32 0.5, %v4158_v57  ;;  %v1789_v60 = vadd.f32 0.5, %v1788_v58 }
0x1186   :  { %v1955_v63 = vadd.f32 0.5, %v1954_v14  ;;  %v1790_v16 = vmul.f32 %v1789_v60, %v4771_v40  ;;  %v4871_v40 = vld [vmem:[#allocation9 + $0x18] sm:$0xff] }
0x1188   :  { %v1956_v12 = vmul.f32 %v1955_v63, %v4775_v43  ;;  %v4884_v43 = vld [vmem:[#allocation8 + $0x10] sm:$0xff] }
0x11f4   :  { %v1793_v61 = vpop.permute.xlu0 %1792 }
0x11f5   :  { %v1795_v62 = vmul.f32 %v1793_v61, %v1789_v60 }
0x11f6   :  { %v1959_v0 = vpop.permute.xlu1 %1958 }
0x11f7   :  { %v1961_v2 = vmul.f32 %v1959_v0, %v1955_v63  ;;  %1797 = vrot.lane.b32.xlu0 %v1795_v62, %s4340_s18 }
0x11f9   :  { %1963 = vrot.lane.b32.xlu1 %v1961_v2, %s4340_s18 }
0x1269   :  { %v1798_v9 = vpop.permute.xlu0 %1797 }
0x126a   :  { %v4828_v11 = vadd.f32 %v1798_v9, %v1790_v16 }
0x126b   :  { %v1964_v13 = vpop.permute.xlu1 %1963 }
0x126c   :  { %4159 = vtanh.f32 %v4828_v11  ;;  %v4832_v15 = vadd.f32 %v1964_v13, %v1956_v12 }
0x126e   :  { %4161 = vtanh.f32 %v4832_v15 }
0x1279   :  { %v4160_v17 = vpop.eup %4159 }
0x127a   :  { %1803 = vrot.lane.b32.xlu0 %v4160_v17, %s4340_s18 }
0x127b   :  { %v4162_v18 = vpop.eup %4161 }
0x127c   :  { %1969 = vrot.lane.b32.xlu1 %v4162_v18, %s4340_s18 }
0x12ec   :  { %v1804_v20 = vpop.permute.xlu0 %1803 }
0x12ed   :  { %v4837_v21 = vmul.f32 %v1804_v20, %v1789_v60 }
0x12ee   :  { %v1970_v23 = vpop.permute.xlu1 %1969 }
0x12ef   :  { %v1972_v24 = vmul.f32 %v1970_v23, %v1955_v63  ;;  %1878 = vrot.lane.b32.xlu0 %v4837_v21, %s4341_s19 }
0x12f1   :  { %1974 = vrot.lane.b32.xlu1 %v1972_v24, %s4341_s19 }
0x12f3   :  { %200 = vbcast.lane.b32.xlu0 %v198_v25, 256 }
0x1361   :  { %v1879_v26 = vpop.permute.xlu0 %1878 }
0x1362   :  { %3962 = vmatmul.mubr.msk.f32.vlgmr.msra.gmra.mxu1 %vm230_vm1, %v1879_v26  ;;  %v4942_v26 = vld [vmem:[%s5221_s5] ss:$0 sm:$0xff] }
0x1363   :  { %3976 = vmatpush3.msra.mxu1 %v4845_v27  ;;  %v1975_v35 = vpop.permute.xlu1 %1974  ;;  %3983 = vmatprep.mubr.msk.f32.mxu1 %vm4339_vm0, %v4338_v1 }
0x1364   :  { %3973 = vmatmul.mubr.msk.f32.vlgmr.msra.gmra.mxu0 %vm230_vm1, %v1975_v35  ;;  %3977 = vmatprep.subr.mxu1 %v4338_v1 }
0x1365   :  { %3978 = vmatpush3.msra.mxu1 %v4852_v8  ;;  %3987 = vmatpush3.msra.mxu0 %v4855_v10  ;;  %v201_v48 = vpop.permute.xlu0 %200 }
0x1366   :  { %3979 = vmatprep.subr.mxu1 %v4338_v1  ;;  %3988 = vmatprep.subr.mxu0 %v4338_v1  ;;  %v215_v54 = vmul.f32 %v4219_v53, %v201_v48 }
0x1367   :  { %3980 = vmatpush3.msra.mxu1 %v4860_v37  ;;  %3989 = vmatpush3.msra.mxu0 %v4863_v38 }
0x1368   :  { %3981 = vmatprep.subr.mxu1 %v4338_v1  ;;  %3990 = vmatprep.subr.mxu0 %v4338_v1  ;;  %v229_v6 = vadd.f32 %v4220_v5, %v215_v54 }
0x1369   :  { %3982 = vmatpush3.msra.mxu1 %v4868_v39  ;;  %3991 = vmatpush3.msra.mxu0 %v4871_v40 }
0x136a   :  { %3984 = vmatmul.mubr.msk.f32.vlgmr.msra.gmra.mxu1 %vm230_vm1, %v1975_v35  ;;  %3997 = vmatprep.subr.mxu1 %v4338_v1 }
0x136b   :  { %3998 = vmatpush3.msra.mxu1 %v4876_v41  ;;  %3992 = vmatprep.subr.mxu0 %v4338_v1 }
0x136c   :  { %3999 = vmatprep.subr.mxu1 %v4338_v1  ;;  %3993 = vmatpush3.msra.mxu0 %v4881_v42 }
0x136d   :  { %4000 = vmatpush3.msra.mxu1 %v4884_v43  ;;  %3994 = vmatprep.mubr.msk.f32.mxu0 %vm4339_vm0, %v4338_v1 }
0x136e   :  { %4001 = vmatprep.subr.mxu1 %v4338_v1  ;;  %4005 = vmatprep.mubr.msk.f32.mxu1 %vm4339_vm0, %v4338_v1 }
0x136f   :  { %4002 = vmatpush3.msra.mxu1 %v4892_v44  ;;  %2360 = vmatprep.subr.mxu0 %v4855_v10 }
0x1370   :  { %4003 = vmatprep.subr.mxu1 %v4338_v1 }
0x1371   :  { %4004 = vmatpush3.msra.mxu1 %v4897_v47 }
0x1372   :  { %4008 = vmatprep.subr.mxu1 %v4338_v1 }
0x1422   :  { %v1948_v50 = vpop.f32.mrf.mxu1 }
0x1424   :  { %v2044_v49 = vpop.f32.mrf.mxu0  ;;  %v3963_v51 = vpop.f32.mrf.mxu1 }
0x1425   :  { %v2045_v56 = vadd.f32 %v2044_v49, %v1948_v50 }
0x1426   :  { %v3974_v3 = vpop.f32.mrf.mxu0 }
0x1427   :  { %v2048_v4 = vadd.f32 %v4535_v46, %v2045_v56 }
0x1429   :  { %4163 = vtanh.f32 %v2048_v4 }
0x142a   :  { %v2135_v28 = vpop.f32.mrf.mxu1 }
0x142b   :  { %v2214_v29 = vadd.f32 %v2135_v28, %v229_v6  ;;  %v4950_v6 = vld [vmem:[#allocation9 + $0x30] sm:$0xff]  ;;  %v4952_v28 = vld [vmem:[#allocation9 + $0x20] sm:$0xff] }
0x142c   :  { %v3985_v30 = vpop.f32.mrf.mxu1 }
0x142d   :  { %4165 = vtanh.f32 %v2214_v29  ;;  %v4957_v29 = vld [vmem:[#allocation9 + $0x10] sm:$0xff]  ;;  %v4963_v30 = vld [vmem:[#allocation9] sm:$0xff] }
0x1436   :  { %v4164_v31 = vpop.eup %4163 }
0x1437   :  { %2054 = vrot.lane.b32.xlu1 %v4164_v31, %s4340_s18  ;;  %v2050_v33 = vmul.f32 0.5, %v4164_v31 }
0x1439   :  { %v2051_v34 = vadd.f32 0.5, %v2050_v33 }
0x143a   :  { %v4166_v32 = vpop.eup %4165 }
0x143b   :  { %2220 = vrot.lane.b32.xlu0 %v4166_v32, %s4340_s18  ;;  %v2216_v36 = vmul.f32 0.5, %v4166_v32  ;;  %v2052_v60 = vmul.f32 %v2051_v34, %v4828_v11 }
0x143d   :  { %v2217_v57 = vadd.f32 0.5, %v2216_v36  ;;  %v4993_v36 = vld [vmem:[%s5223_s7] ss:$0 sm:$0xff] }
0x143f   :  { %v2218_v63 = vmul.f32 %v2217_v57, %v4832_v15 }
0x14a9   :  { %v2055_v46 = vpop.permute.xlu1 %2054 }
0x14aa   :  { %v2057_v55 = vmul.f32 %v2055_v46, %v2051_v34 }
0x14ac   :  { %2059 = vrot.lane.b32.xlu1 %v2057_v55, %s4340_s18 }
0x14ad   :  { %v2221_v58 = vpop.permute.xlu0 %2220 }
0x14ae   :  { %v2223_v14 = vmul.f32 %v2221_v58, %v2217_v57 }
0x14b0   :  { %2225 = vrot.lane.b32.xlu0 %v2223_v14, %s4340_s18 }
0x151e   :  { %v2060_v61 = vpop.permute.xlu1 %2059 }
0x151f   :  { %v2062_v62 = vadd.f32 %v2060_v61, %v2052_v60 }
0x1521   :  { %4167 = vtanh.f32 %v2062_v62 }
0x1522   :  { %v2226_v0 = vpop.permute.xlu0 %2225 }
0x1523   :  { %v4914_v2 = vadd.f32 %v2226_v0, %v2218_v63 }
0x1525   :  { %4169 = vtanh.f32 %v4914_v2 }
0x152e   :  { %v4168_v16 = vpop.eup %4167 }
0x152f   :  { %2065 = vrot.lane.b32.xlu1 %v4168_v16, %s4340_s18 }
0x1532   :  { %v4170_v9 = vpop.eup %4169 }
0x1533   :  { %2231 = vrot.lane.b32.xlu0 %v4170_v9, %s4340_s18 }
0x15a1   :  { %v2066_v12 = vpop.permute.xlu1 %2065 }
0x15a2   :  { %v4919_v13 = vmul.f32 %v2066_v12, %v2051_v34 }
0x15a4   :  { %2140 = vrot.lane.b32.xlu1 %v4919_v13, %s4341_s19 }
0x15a5   :  { %v2232_v11 = vpop.permute.xlu0 %2231 }
0x15a6   :  { %v2234_v17 = vmul.f32 %v2232_v11, %v2217_v57 }
0x15a8   :  { %2236 = vrot.lane.b32.xlu0 %v2234_v17, %s4341_s19 }
0x1616   :  { %v2141_v15 = vpop.permute.xlu1 %2140 }
0x1617   :  { %3995 = vmatmul.mubr.msk.f32.vlgmr.msra.gmra.mxu0 %vm230_vm1, %v2141_v15 }
0x1618   :  { %2400 = vmatprep.mubr.f32.mxu0 %v4338_v1  ;;  %2361 = vmatpush1.msra.mxu0 %v4950_v6 }
0x1619   :  { %2362 = vmatprep.subr.mxu0 %v4863_v38 }
0x161a   :  { %v2237_v18 = vpop.permute.xlu0 %2236  ;;  %2363 = vmatpush1.msra.mxu0 %v4952_v28 }
0x161b   :  { %4006 = vmatmul.mubr.msk.f32.vlgmr.msra.gmra.mxu1 %vm230_vm1, %v2237_v18  ;;  %2364 = vmatprep.subr.mxu0 %v4871_v40 }
0x161c   :  { %4009 = vmatpush3.msra.mxu1 %v4845_v27  ;;  %4016 = vmatprep.mubr.msk.f32.mxu1 %vm4339_vm0, %v4338_v1 }
0x161d   :  { %4010 = vmatprep.subr.mxu1 %v4338_v1  ;;  %2365 = vmatpush1.msra.mxu0 %v4957_v29 }
0x161e   :  { %4011 = vmatpush3.msra.mxu1 %v4852_v8  ;;  %2366 = vmatprep.subr.mxu0 %v4881_v42 }
0x161f   :  { %4012 = vmatprep.subr.mxu1 %v4338_v1  ;;  %2367 = vmatpush1.msra.mxu0 %v4963_v30 }
0x1620   :  { %4013 = vmatpush3.msra.mxu1 %v4860_v37  ;;  %4019 = vmatprep.subr.mxu0 %v4338_v1 }
0x1621   :  { %4014 = vmatprep.subr.mxu1 %v4338_v1 }
0x1622   :  { %4015 = vmatpush3.msra.mxu1 %v4868_v39 }
0x1623   :  { %4017 = vmatmul.mubr.msk.f32.vlgmr.msra.gmra.mxu1 %vm230_vm1, %v2237_v18  ;;  %2629 = vmatprep.subr.mxu1 %v4855_v10 }
0x1624   :  { %2669 = vmatprep.mubr.f32.mxu1 %v4338_v1  ;;  %2630 = vmatpush1.msra.mxu1 %v4950_v6 }
0x1625   :  { %2631 = vmatprep.subr.mxu1 %v4863_v38 }
0x1626   :  { %2632 = vmatpush1.msra.mxu1 %v4952_v28 }
0x1627   :  { %2633 = vmatprep.subr.mxu1 %v4871_v40 }
0x1628   :  { %2634 = vmatpush1.msra.mxu1 %v4957_v29 }
0x1629   :  { %2635 = vmatprep.subr.mxu1 %v4881_v42 }
0x162a   :  { %2636 = vmatpush1.msra.mxu1 %v4963_v30 }
0x162b   :  { %4041 = vmatprep.subr.mxu1 %v4338_v1 }
0x16d7   :  { %v2210_v20 = vpop.f32.mrf.mxu0 }
0x16d9   :  { %v3996_v22 = vpop.f32.mrf.mxu0 }
0x16db   :  { %v2306_v23 = vpop.f32.mrf.mxu1 }
0x16dc   :  { %v2307_v24 = vadd.f32 %v2306_v23, %v2210_v20 }
0x16dd   :  { %v4007_v25 = vpop.f32.mrf.mxu1 }
0x16de   :  { %v2310_v35 = vadd.f32 %v4942_v26, %v2307_v24 }
0x16e0   :  { %4171 = vtanh.f32 %v2310_v35 }
0x16e3   :  { %v2473_v48 = vpop.f32.mrf.mxu1 }
0x16e5   :  { %v4018_v50 = vpop.f32.mrf.mxu1 }
0x16ed   :  { %v4172_v49 = vpop.eup %4171 }
0x16ee   :  { %2316 = vrot.lane.b32.xlu1 %v4172_v49, %s4340_s18  ;;  %v2312_v51 = vmul.f32 0.5, %v4172_v49 }
0x16f0   :  { %v2313_v53 = vadd.f32 0.5, %v2312_v51 }
0x16f2   :  { %v2314_v3 = vmul.f32 %v2313_v53, %v2062_v62 }
0x1760   :  { %v2317_v54 = vpop.permute.xlu1 %2316 }
0x1761   :  { %v2319_v56 = vmul.f32 %v2317_v54, %v2313_v53 }
0x1763   :  { %2321 = vrot.lane.b32.xlu0 %v2319_v56, %s4340_s18 }
0x17d5   :  { %v2322_v4 = vpop.permute.xlu0 %2321 }
0x17d6   :  { %v4947_v5 = vadd.f32 %v2322_v4, %v2314_v3 }
0x17d8   :  { %4173 = vtanh.f32 %v4947_v5 }
0x17e5   :  { %v4174_v31 = vpop.eup %4173 }
0x17e6   :  { %2327 = vrot.lane.b32.xlu1 %v4174_v31, %s4340_s18 }
0x1858   :  { %v2328_v32 = vpop.permute.xlu1 %2327 }
0x1859   :  { %v4975_v33 = vmul.f32 %v2328_v32, %v2313_v53 }
0x185b   :  { %2332 = vrot.lane.b32.xlu0 %v4975_v33, %s4341_s19 }
0x18cd   :  { %v2333_v34 = vpop.permute.xlu0 %2332 }
0x18ce   :  { %3569 = vmatmul.mubr.msk.f32.vlgmr.msra.gmra.mxu0 %vm230_vm1, %v2333_v34 }
0x18cf   :  { %4020 = vmatpush3.msra.mxu0 %v4876_v41  ;;  %4027 = vmatprep.mubr.msk.f32.mxu0 %vm4339_vm0, %v4338_v1 }
0x18d0   :  { %4021 = vmatprep.subr.mxu0 %v4338_v1 }
0x18d1   :  { %4022 = vmatpush3.msra.mxu0 %v4884_v43 }
0x18d2   :  { %4023 = vmatprep.subr.mxu0 %v4338_v1 }
0x18d3   :  { %4024 = vmatpush3.msra.mxu0 %v4892_v44 }
0x18d4   :  { %4025 = vmatprep.subr.mxu0 %v4338_v1 }
0x18d5   :  { %4026 = vmatpush3.msra.mxu0 %v4897_v47 }
0x18d6   :  { %4030 = vmatprep.subr.mxu0 %v4338_v1 }
0x198e   :  { %v2402_v46 = vpop.f32.mrf.mxu0 }
0x198f   :  { %v2474_v55 = vadd.f32 %v2473_v48, %v2402_v46 }
0x1991   :  { %v2483_v57 = vadd.f32 %v4993_v36, %v2474_v55 }
0x1993   :  { %4175 = vtanh.f32 %v2483_v57 }
0x19a0   :  { %v4176_v58 = vpop.eup %4175 }
0x19a1   :  { %2489 = vrot.lane.b32.xlu1 %v4176_v58, %s4340_s18  ;;  %v2485_v14 = vmul.f32 0.5, %v4176_v58 }
0x19a3   :  { %v2486_v60 = vadd.f32 0.5, %v2485_v14 }
0x19a5   :  { %v2487_v63 = vmul.f32 %v2486_v60, %v4914_v2  ;;  %v2404_v2 = vpop.f32.mrf.mxu0 }
0x1a13   :  { %v2490_v61 = vpop.permute.xlu1 %2489 }
0x1a14   :  { %v2492_v62 = vmul.f32 %v2490_v61, %v2486_v60 }
0x1a16   :  { %2494 = vrot.lane.b32.xlu0 %v2492_v62, %s4340_s18 }
0x1a88   :  { %v2495_v0 = vpop.permute.xlu0 %2494 }
0x1a89   :  { %v4999_v16 = vadd.f32 %v2495_v0, %v2487_v63 }
0x1a8b   :  { %4177 = vtanh.f32 %v4999_v16 }
0x1a98   :  { %v4178_v9 = vpop.eup %4177 }
0x1a99   :  { %2500 = vrot.lane.b32.xlu1 %v4178_v9, %s4340_s18 }
0x1b0b   :  { %v2501_v12 = vpop.permute.xlu1 %2500 }
0x1b0c   :  { %v2503_v11 = vmul.f32 %v2501_v12, %v2486_v60 }
0x1b0e   :  { %2505 = vrot.lane.b32.xlu0 %v2503_v11, %s4341_s19 }
0x1b80   :  { %v2506_v17 = vpop.permute.xlu0 %2505 }
0x1b81   :  { %4028 = vmatmul.mubr.msk.f32.vlgmr.msra.gmra.mxu0 %vm230_vm1, %v2506_v17 }
0x1b82   :  { %4031 = vmatpush3.msra.mxu0 %v4845_v27  ;;  %4038 = vmatprep.mubr.msk.f32.mxu0 %vm4339_vm0, %v4338_v1 }
0x1b83   :  { %4032 = vmatprep.subr.mxu0 %v4338_v1 }
0x1b84   :  { %4033 = vmatpush3.msra.mxu0 %v4852_v8 }
0x1b85   :  { %4034 = vmatprep.subr.mxu0 %v4338_v1 }
0x1b86   :  { %4035 = vmatpush3.msra.mxu0 %v4860_v37 }
0x1b87   :  { %4036 = vmatprep.subr.mxu0 %v4338_v1 }
0x1b88   :  { %4037 = vmatpush3.msra.mxu0 %v4868_v39 }
0x1b89   :  { %4039 = vmatmul.mubr.msk.f32.vlgmr.msra.gmra.mxu0 %vm230_vm1, %v2506_v17  ;;  %2892 = vmatprep.subr.mxu0 %v4855_v10 }
0x1b8a   :  { %2893 = vmatpush1.msra.mxu0 %v4950_v6  ;;  %2932 = vmatprep.mubr.f32.mxu0 %v4338_v1 }
0x1b8b   :  { %2894 = vmatprep.subr.mxu0 %v4863_v38 }
0x1b8c   :  { %2895 = vmatpush1.msra.mxu0 %v4952_v28 }
0x1b8d   :  { %2896 = vmatprep.subr.mxu0 %v4871_v40 }
0x1b8e   :  { %2897 = vmatpush1.msra.mxu0 %v4957_v29 }
0x1b8f   :  { %2898 = vmatprep.subr.mxu0 %v4881_v42 }
0x1b90   :  { %2899 = vmatpush1.msra.mxu0 %v4963_v30 }
0x1b91   :  { %4063 = vmatprep.subr.mxu0 %v4338_v1 }
0x1c41   :  { %v2575_v15 = vpop.f32.mrf.mxu0 }
0x1c42   :  { %v2576_v18 = vadd.f32 %v2575_v15, %v2404_v2 }
0x1c43   :  { %v4029_v20 = vpop.f32.mrf.mxu0 }
0x1c44   :  { %v2579_v22 = vadd.f32 %v4942_v26, %v2576_v18 }
0x1c46   :  { %4179 = vtanh.f32 %v2579_v22 }
0x1c49   :  { %v2742_v23 = vpop.f32.mrf.mxu0 }
0x1c4b   :  { %v4040_v24 = vpop.f32.mrf.mxu0 }
0x1c53   :  { %v4180_v25 = vpop.eup %4179 }
0x1c54   :  { %2585 = vrot.lane.b32.xlu1 %v4180_v25, %s4340_s18  ;;  %v2581_v35 = vmul.f32 0.5, %v4180_v25 }
0x1c56   :  { %v2582_v48 = vadd.f32 0.5, %v2581_v35 }
0x1c58   :  { %v2583_v51 = vmul.f32 %v2582_v48, %v4947_v5 }
0x1cc6   :  { %v2586_v50 = vpop.permute.xlu1 %2585 }
0x1cc7   :  { %v2588_v49 = vmul.f32 %v2586_v50, %v2582_v48 }
0x1cc9   :  { %2590 = vrot.lane.b32.xlu0 %v2588_v49, %s4340_s18 }
0x1d3b   :  { %v2591_v53 = vpop.permute.xlu0 %2590 }
0x1d3c   :  { %v5029_v54 = vadd.f32 %v2591_v53, %v2583_v51 }
0x1d3e   :  { %4181 = vtanh.f32 %v5029_v54 }
0x1d4b   :  { %v4182_v56 = vpop.eup %4181 }
0x1d4c   :  { %2596 = vrot.lane.b32.xlu1 %v4182_v56, %s4340_s18 }
0x1dbe   :  { %v2597_v3 = vpop.permute.xlu1 %2596 }
0x1dbf   :  { %v5033_v4 = vmul.f32 %v2597_v3, %v2582_v48 }
0x1dc1   :  { %2601 = vrot.lane.b32.xlu0 %v5033_v4, %s4341_s19 }
0x1e33   :  { %v2602_v31 = vpop.permute.xlu0 %2601 }
0x1e34   :  { %3573 = vmatmul.mubr.msk.f32.vlgmr.msra.gmra.mxu1 %vm230_vm1, %v2602_v31 }
0x1e35   :  { %4042 = vmatpush3.msra.mxu1 %v4876_v41  ;;  %4049 = vmatprep.mubr.msk.f32.mxu1 %vm4339_vm0, %v4338_v1 }
0x1e36   :  { %4043 = vmatprep.subr.mxu1 %v4338_v1 }
0x1e37   :  { %4044 = vmatpush3.msra.mxu1 %v4884_v43 }
0x1e38   :  { %4045 = vmatprep.subr.mxu1 %v4338_v1 }
0x1e39   :  { %4046 = vmatpush3.msra.mxu1 %v4892_v44 }
0x1e3a   :  { %4047 = vmatprep.subr.mxu1 %v4338_v1 }
0x1e3b   :  { %4048 = vmatpush3.msra.mxu1 %v4897_v47 }
0x1e3c   :  { %4052 = vmatprep.subr.mxu1 %v4338_v1 }
0x1ef4   :  { %v2671_v5 = vpop.f32.mrf.mxu1 }
0x1ef5   :  { %v2743_v32 = vadd.f32 %v2742_v23, %v2671_v5 }
0x1ef7   :  { %v2746_v34 = vadd.f32 %v4993_v36, %v2743_v32 }
0x1ef9   :  { %4183 = vtanh.f32 %v2746_v34 }
0x1f06   :  { %v4184_v46 = vpop.eup %4183 }
0x1f07   :  { %2752 = vrot.lane.b32.xlu1 %v4184_v46, %s4340_s18  ;;  %v2748_v55 = vmul.f32 0.5, %v4184_v46 }
0x1f09   :  { %v2749_v57 = vadd.f32 0.5, %v2748_v55 }
0x1f0b   :  { %v2750_v60 = vmul.f32 %v2749_v57, %v4999_v16  ;;  %v2673_v16 = vpop.f32.mrf.mxu1 }
0x1f79   :  { %v2753_v58 = vpop.permute.xlu1 %2752 }
0x1f7a   :  { %v2755_v14 = vmul.f32 %v2753_v58, %v2749_v57 }
0x1f7c   :  { %2757 = vrot.lane.b32.xlu0 %v2755_v14, %s4340_s18 }
0x1fee   :  { %v2758_v61 = vpop.permute.xlu0 %2757 }
0x1fef   :  { %v5052_v62 = vadd.f32 %v2758_v61, %v2750_v60 }
0x1ff1   :  { %4185 = vtanh.f32 %v5052_v62 }
0x1ffe   :  { %v4186_v63 = vpop.eup %4185 }
0x1fff   :  { %2763 = vrot.lane.b32.xlu1 %v4186_v63, %s4340_s18 }
0x2071   :  { %v2764_v0 = vpop.permute.xlu1 %2763 }
0x2072   :  { %v2766_v9 = vmul.f32 %v2764_v0, %v2749_v57 }
0x2074   :  { %2768 = vrot.lane.b32.xlu0 %v2766_v9, %s4341_s19 }
0x20e6   :  { %v2769_v12 = vpop.permute.xlu0 %2768 }
0x20e7   :  { %4050 = vmatmul.mubr.msk.f32.vlgmr.msra.gmra.mxu1 %vm230_vm1, %v2769_v12 }
0x20e8   :  { %4053 = vmatpush3.msra.mxu1 %v4845_v27  ;;  %4060 = vmatprep.mubr.msk.f32.mxu1 %vm4339_vm0, %v4338_v1 }
0x20e9   :  { %4054 = vmatprep.subr.mxu1 %v4338_v1 }
0x20ea   :  { %4055 = vmatpush3.msra.mxu1 %v4852_v8 }
0x20eb   :  { %4056 = vmatprep.subr.mxu1 %v4338_v1 }
0x20ec   :  { %4057 = vmatpush3.msra.mxu1 %v4860_v37 }
0x20ed   :  { %4058 = vmatprep.subr.mxu1 %v4338_v1 }
0x20ee   :  { %4059 = vmatpush3.msra.mxu1 %v4868_v39 }
0x20ef   :  { %4061 = vmatmul.mubr.msk.f32.vlgmr.msra.gmra.mxu1 %vm230_vm1, %v2769_v12  ;;  %3155 = vmatprep.subr.mxu1 %v4855_v10 }
0x20f0   :  { %3156 = vmatpush1.msra.mxu1 %v4950_v6  ;;  %3195 = vmatprep.mubr.f32.mxu1 %v4338_v1 }
0x20f1   :  { %3157 = vmatprep.subr.mxu1 %v4863_v38 }
0x20f2   :  { %3158 = vmatpush1.msra.mxu1 %v4952_v28 }
0x20f3   :  { %3159 = vmatprep.subr.mxu1 %v4871_v40 }
0x20f4   :  { %3160 = vmatpush1.msra.mxu1 %v4957_v29 }
0x20f5   :  { %3161 = vmatprep.subr.mxu1 %v4881_v42 }
0x20f6   :  { %3162 = vmatpush1.msra.mxu1 %v4963_v30 }
0x20f7   :  { %4085 = vmatprep.subr.mxu1 %v4338_v1 }
0x21a7   :  { %v2838_v10 = vpop.f32.mrf.mxu1 }
0x21a8   :  { %v2839_v11 = vadd.f32 %v2838_v10, %v2673_v16 }
0x21a9   :  { %v4051_v6 = vpop.f32.mrf.mxu1 }
0x21aa   :  { %v2842_v17 = vadd.f32 %v4942_v26, %v2839_v11 }
0x21ac   :  { %4187 = vtanh.f32 %v2842_v17 }
0x21af   :  { %v3005_v38 = vpop.f32.mrf.mxu1 }
0x21b1   :  { %v4062_v2 = vpop.f32.mrf.mxu1 }
0x21b9   :  { %v4188_v28 = vpop.eup %4187 }
0x21ba   :  { %2848 = vrot.lane.b32.xlu1 %v4188_v28, %s4340_s18  ;;  %v2844_v40 = vmul.f32 0.5, %v4188_v28 }
0x21bc   :  { %v2845_v29 = vadd.f32 0.5, %v2844_v40 }
0x21be   :  { %v2846_v30 = vmul.f32 %v2845_v29, %v5029_v54 }
0x222c   :  { %v2849_v15 = vpop.permute.xlu1 %2848 }
0x222d   :  { %v2851_v42 = vmul.f32 %v2849_v15, %v2845_v29 }
0x222f   :  { %2853 = vrot.lane.b32.xlu0 %v2851_v42, %s4340_s18 }
0x22a1   :  { %v2854_v18 = vpop.permute.xlu0 %2853 }
0x22a2   :  { %v5082_v20 = vadd.f32 %v2854_v18, %v2846_v30 }
0x22a4   :  { %4189 = vtanh.f32 %v5082_v20 }
0x22b1   :  { %v4190_v22 = vpop.eup %4189 }
0x22b2   :  { %2859 = vrot.lane.b32.xlu1 %v4190_v22, %s4340_s18 }
0x2324   :  { %v2860_v23 = vpop.permute.xlu1 %2859 }
0x2325   :  { %v5086_v24 = vmul.f32 %v2860_v23, %v2845_v29 }
0x2327   :  { %2864 = vrot.lane.b32.xlu0 %v5086_v24, %s4341_s19 }
0x2399   :  { %v2865_v25 = vpop.permute.xlu0 %2864 }
0x239a   :  { %3576 = vmatmul.mubr.msk.f32.vlgmr.msra.gmra.mxu0 %vm230_vm1, %v2865_v25 }
0x239b   :  { %4064 = vmatpush3.msra.mxu0 %v4876_v41  ;;  %4071 = vmatprep.mubr.msk.f32.mxu0 %vm4339_vm0, %v4338_v1 }
0x239c   :  { %4065 = vmatprep.subr.mxu0 %v4338_v1 }
0x239d   :  { %4066 = vmatpush3.msra.mxu0 %v4884_v43 }
0x239e   :  { %4067 = vmatprep.subr.mxu0 %v4338_v1 }
0x239f   :  { %4068 = vmatpush3.msra.mxu0 %v4892_v44 }
0x23a0   :  { %4069 = vmatprep.subr.mxu0 %v4338_v1 }
0x23a1   :  { %4070 = vmatpush3.msra.mxu0 %v4897_v47 }
0x23a2   :  { %4074 = vmatprep.subr.mxu0 %v4338_v1 }
0x245a   :  { %v2934_v35 = vpop.f32.mrf.mxu0 }
0x245b   :  { %v3006_v48 = vadd.f32 %v3005_v38, %v2934_v35 }
0x245c   :  { %v2936_v57 = vpop.f32.mrf.mxu0 }
0x245d   :  { %v3009_v50 = vadd.f32 %v4993_v36, %v3006_v48 }
0x245f   :  { %4191 = vtanh.f32 %v3009_v50 }
0x246c   :  { %v4192_v49 = vpop.eup %4191 }
0x246d   :  { %3015 = vrot.lane.b32.xlu1 %v4192_v49, %s4340_s18  ;;  %v3011_v51 = vmul.f32 0.5, %v4192_v49 }
0x246f   :  { %v3012_v53 = vadd.f32 0.5, %v3011_v51 }
0x2471   :  { %v3013_v3 = vmul.f32 %v3012_v53, %v5052_v62 }
0x24df   :  { %v3016_v54 = vpop.permute.xlu1 %3015 }
0x24e0   :  { %v3018_v56 = vmul.f32 %v3016_v54, %v3012_v53  ;;  %v3582_v54 = vld [vmem:[%s5224_s8] ss:$0 sm:$0xff]  ;;  %s4343_s8 = smov [#allocation11]  }
0x24e1   :  { %s3533_s27 = sshll.u32 %s4343_s8, 4  ;;  %s3534_s27 = int_to_ptr.vmem [resolvable:$true] %s3533_s27 }
0x24e2   :  { %3020 = vrot.lane.b32.xlu0 %v3018_v56, %s4340_s18  ;;  %s4302_s28 = scalar_lea.vmem %s3534_s27, 128  ;;  %p4307_p7 = scmp.lt.s32.totalorder %s3534_s27, %s3534_s27 }
0x24e3   :  { %p4303_p6 = scmp.ne.s32.totalorder %s3534_s27, %s4302_s28  ;;  %p4308_p8 = scmp.lt.s32.totalorder %s4302_s28, %s4302_s28 }
0x24e5   :  { %p4309_p9 = por %p4308_p8, %p4307_p7 }
0x24e7   :  { %p4310_p10 = pnand %p4309_p9, %p4303_p6 }
0x2554   :  { %v3021_v31 = vpop.permute.xlu0 %3020 }
0x2555   :  { %v5105_v5 = vadd.f32 %v3021_v31, %v3013_v3 }
0x2557   :  { %4193 = vtanh.f32 %v5105_v5 }
0x2564   :  { %v4194_v32 = vpop.eup %4193 }
0x2565   :  { %3026 = vrot.lane.b32.xlu1 %v4194_v32, %s4340_s18 }
0x25d7   :  { %v3027_v34 = vpop.permute.xlu1 %3026 }
0x25d8   :  { %v3029_v46 = vmul.f32 %v3027_v34, %v3012_v53 }
0x25da   :  { %3031 = vrot.lane.b32.xlu0 %v3029_v46, %s4341_s19 }
0x264c   :  { %v3032_v55 = vpop.permute.xlu0 %3031 }
0x264d   :  { %4072 = vmatmul.mubr.msk.f32.vlgmr.msra.gmra.mxu0 %vm230_vm1, %v3032_v55 }
0x264e   :  { %4075 = vmatpush3.msra.mxu0 %v4845_v27  ;;  %4082 = vmatprep.mubr.msk.f32.mxu0 %vm4339_vm0, %v4338_v1 }
0x264f   :  { %4076 = vmatprep.subr.mxu0 %v4338_v1 }
0x2650   :  { %4077 = vmatpush3.msra.mxu0 %v4852_v8 }
0x2651   :  { %4078 = vmatprep.subr.mxu0 %v4338_v1 }
0x2652   :  { %4079 = vmatpush3.msra.mxu0 %v4860_v37 }
0x2653   :  { %4080 = vmatprep.subr.mxu0 %v4338_v1 }
0x2654   :  { %4081 = vmatpush3.msra.mxu0 %v4868_v39 }
0x2655   :  { %4083 = vmatmul.mubr.msk.f32.vlgmr.msra.gmra.mxu0 %vm230_vm1, %v3032_v55 }
0x270d   :  { %v3101_v58 = vpop.f32.mrf.mxu0 }
0x270e   :  { %v3102_v27 = vadd.f32 %v3101_v58, %v2936_v57 }
0x270f   :  { %v4073_v14 = vpop.f32.mrf.mxu0 }
0x2710   :  { %v3105_v60 = vadd.f32 %v4942_v26, %v3102_v27 }
0x2712   :  { %4195 = vtanh.f32 %v3105_v60 }
0x2715   :  { %v3268_v61 = vpop.f32.mrf.mxu0 }
0x2717   :  { %v4084_v62 = vpop.f32.mrf.mxu0 }
0x271f   :  { %v4196_v8 = vpop.eup %4195 }
0x2720   :  { %3111 = vrot.lane.b32.xlu1 %v4196_v8, %s4340_s18  ;;  %v3107_v63 = vmul.f32 0.5, %v4196_v8 }
0x2722   :  { %v3108_v37 = vadd.f32 0.5, %v3107_v63 }
0x2724   :  { %v3109_v39 = vmul.f32 %v3108_v37, %v5082_v20 }
0x2792   :  { %v3112_v0 = vpop.permute.xlu1 %3111 }
0x2793   :  { %v3114_v9 = vmul.f32 %v3112_v0, %v3108_v37 }
0x2795   :  { %3116 = vrot.lane.b32.xlu0 %v3114_v9, %s4340_s18 }
0x2807   :  { %v3117_v12 = vpop.permute.xlu0 %3116 }
0x2808   :  { %v5125_v16 = vadd.f32 %v3117_v12, %v3109_v39 }
0x280a   :  { %4197 = vtanh.f32 %v5125_v16 }
0x2817   :  { %v4198_v10 = vpop.eup %4197 }
0x2818   :  { %3122 = vrot.lane.b32.xlu1 %v4198_v10, %s4340_s18 }
0x288a   :  { %v3123_v11 = vpop.permute.xlu1 %3122 }
0x288b   :  { %v5129_v6 = vmul.f32 %v3123_v11, %v3108_v37 }
0x288d   :  { %3127 = vrot.lane.b32.xlu0 %v5129_v6, %s4341_s19 }
0x28ff   :  { %v3128_v17 = vpop.permute.xlu0 %3127 }
0x2900   :  { %3579 = vmatmul.mubr.msk.f32.vlgmr.msra.gmra.mxu1 %vm230_vm1, %v3128_v17 }
0x2901   :  { %4086 = vmatpush3.msra.mxu1 %v4876_v41  ;;  %4093 = vmatprep.mubr.msk.f32.mxu1 %vm4339_vm0, %v4338_v1 }
0x2902   :  { %4087 = vmatprep.subr.mxu1 %v4338_v1 }
0x2903   :  { %4088 = vmatpush3.msra.mxu1 %v4884_v43 }
0x2904   :  { %4089 = vmatprep.subr.mxu1 %v4338_v1 }
0x2905   :  { %4090 = vmatpush3.msra.mxu1 %v4892_v44 }
0x2906   :  { %4091 = vmatprep.subr.mxu1 %v4338_v1 }
0x2907   :  { %4092 = vmatpush3.msra.mxu1 %v4897_v47 }
0x29c0   :  { %v3197_v38 = vpop.f32.mrf.mxu1 }
0x29c1   :  { %v3269_v2 = vadd.f32 %v3268_v61, %v3197_v38 }
0x29c2   :  { %v3199_v20 = vpop.f32.mrf.mxu1 }
0x29c3   :  { %v3272_v28 = vadd.f32 %v4993_v36, %v3269_v2 }
0x29c5   :  { %4199 = vtanh.f32 %v3272_v28 }
0x29d2   :  { %v4200_v41 = vpop.eup %4199 }
0x29d3   :  { %3278 = vrot.lane.b32.xlu1 %v4200_v41, %s4340_s18  ;;  %v3274_v40 = vmul.f32 0.5, %v4200_v41 }
0x29d5   :  { %v3275_v29 = vadd.f32 0.5, %v3274_v40 }
0x29d7   :  { %v3276_v44 = vmul.f32 %v3275_v29, %v5105_v5 }
0x2a45   :  { %v3279_v15 = vpop.permute.xlu1 %3278 }
0x2a46   :  { %v3281_v43 = vmul.f32 %v3279_v15, %v3275_v29 }
0x2a48   :  { %3283 = vrot.lane.b32.xlu0 %v3281_v43, %s4340_s18  ;;  %v4342_v43 = vmov 0  }
0x2a49   :  { %4110 = vset.pattern.permute.xlu0 %v4342_v43 }
0x2aba   :  { %v3284_v42 = vpop.permute.xlu0 %3283 }
0x2abb   :  { %v3286_v1 = vadd.f32 %v3284_v42, %v3276_v44 }
0x2abd   :  { %4201 = vtanh.f32 %v3286_v1 }
0x2aca   :  { %v4202_v47 = vpop.eup %4201 }
0x2acb   :  { %3289 = vrot.lane.b32.xlu1 %v4202_v47, %s4340_s18 }
0x2b3d   :  { %v3290_v30 = vpop.permute.xlu1 %3289 }
0x2b3e   :  { %v3292_v36 = vmul.f32 %v3290_v30, %v3275_v29 }
0x2b40   :  { %3294 = vrot.lane.b32.xlu0 %v3292_v36, %s4341_s19 }
0x2bb2   :  { %v3295_v18 = vpop.permute.xlu0 %3294 }
0x2bb3   :  { %4094 = vmatmul.mubr.msk.f32.vlgmr.msra.gmra.mxu1 %vm230_vm1, %v3295_v18 }
0x2c73   :  { %v3364_v22 = vpop.f32.mrf.mxu1 }
0x2c74   :  { %v3365_v23 = vadd.f32 %v3364_v22, %v3199_v20 }
0x2c75   :  { %v4095_v25 = vpop.f32.mrf.mxu1 }
0x2c76   :  { %v3368_v35 = vadd.f32 %v4942_v26, %v3365_v23  ;;  %v3583_v23 = vld [vmem:[#allocation2] ss:$0 sm:$0xff] }
0x2c78   :  { %4203 = vtanh.f32 %v3368_v35 }
0x2c85   :  { %v4204_v48 = vpop.eup %4203 }
0x2c86   :  { %3374 = vrot.lane.b32.xlu1 %v4204_v48, %s4340_s18  ;;  %v3370_v50 = vmul.f32 0.5, %v4204_v48 }
0x2c88   :  { %v5152_v49 = vadd.f32 0.5, %v3370_v50 }
0x2cf8   :  { %v3375_v51 = vpop.permute.xlu1 %3374 }
0x2cf9   :  { %v3377_v53 = vmul.f32 %v3375_v51, %v5152_v49 }
0x2cfb   :  { %3379 = vrot.lane.b32.xlu0 %v3377_v53, %s4340_s18 }
0x2cff   :  { %3394 = vrot.lane.b32.xlu0 %v3582_v54, %s4341_s19 }
0x2d6d   :  { %v3380_v56 = vpop.permute.xlu0 %3379 }
0x2d71   :  { %v5160_v26 = vpop.permute.xlu0 %3394 }
0x2d72   :  { %v3397_v3 = vmul.f32 %v5160_v26, %v4552_v19  ;;  %v3405_v31 = vmul.f32 %v5160_v26, %v4609_v7  ;;  %v3413_v55 = vmul.f32 %v5160_v26, %v4666_v59  ;;  %v3421_v7 = vmul.f32 %v5160_v26, %v4723_v52 }
0x2d73   :  { %v3429_v27 = vmul.f32 %v5160_v26, %v4780_v45  ;;  %v3372_v52 = vmul.f32 %v5152_v49, %v5125_v16  ;;  %v3437_v9 = vmul.f32 %v5160_v26, %v4837_v21  ;;  %v3445_v39 = vmul.f32 %v5160_v26, %v4919_v13 }
0x2d74   :  { %3399 = vrot.lane.b32.xlu1 %v3397_v3, %s4341_s19  ;;  %v3453_v12 = vmul.f32 %v5160_v26, %v4975_v33  ;;  %v3461_v16 = vmul.f32 %v5160_v26, %v5033_v4  ;;  %v3477_v21 = vmul.f32 %v5160_v26, %v5129_v6  ;;  %v3469_v15 = vmul.f32 %v5160_v26, %v5086_v24 }
0x2d75   :  { %v3382_v37 = vadd.f32 %v3380_v56, %v3372_v52 }
0x2d77   :  { %4205 = vtanh.f32 %v3382_v37 }
0x2d78   :  { %3407 = vrot.lane.b32.xlu1 %v3405_v31, %s4341_s19 }
0x2d84   :  { %v4206_v45 = vpop.eup %4205 }
0x2de6   :  { %v3400_v5 = vpop.permute.xlu1 %3399 }
0x2de7   :  { %v3402_v32 = vsel %vm230_vm1, %v3400_v5, 0.0 }
0x2de8   :  { %3403 = vadd.xlane.f32.xlu0 %v3402_v32 }
0x2dea   :  { %v3408_v34 = vpop.permute.xlu1 %3407 }
0x2deb   :  { %v3410_v46 = vsel %vm230_vm1, %v3408_v34, 0.0 }
0x2dec   :  { %3411 = vadd.xlane.f32.xlu1 %v3410_v46 }
0x2dfe   :  { %3415 = vrot.lane.b32.xlu0 %v3413_v55, %s4341_s19 }
0x2e71   :  { %v3404_v19 = vpop.xlane.xlu0 %3403 }
0x2e75   :  { %v3416_v57 = vpop.permute.xlu0 %3415  ;;  %v3412_v14 = vpop.xlane.xlu1 %3411 }
0x2e76   :  { %v3418_v58 = vsel %vm230_vm1, %v3416_v57, 0.0  ;;  %v3494_v59 = vsel %vm3493_vm2, %v3404_v19, %v3412_v14 }
0x2e77   :  { %3419 = vadd.xlane.f32.xlu1 %v3418_v58 }
0x2e88   :  { %3423 = vrot.lane.b32.xlu1 %v3421_v7, %s4341_s19 }
0x2e8c   :  { %3431 = vrot.lane.b32.xlu1 %v3429_v27, %s4341_s19 }
0x2f00   :  { %v3420_v60 = vpop.xlane.xlu1 %3419 }
0x2f01   :  { %v3496_v61 = vsel %vm3495_vm3, %v3494_v59, %v3420_v60 }
0x2f04   :  { %v3424_v62 = vpop.permute.xlu1 %3423 }
0x2f05   :  { %v3426_v8 = vsel %vm230_vm1, %v3424_v62, 0.0 }
0x2f06   :  { %3427 = vadd.xlane.f32.xlu0 %v3426_v8 }
0x2f08   :  { %v3432_v63 = vpop.permute.xlu1 %3431 }
0x2f09   :  { %v3434_v0 = vsel %vm230_vm1, %v3432_v63, 0.0 }
0x2f0a   :  { %3435 = vadd.xlane.f32.xlu1 %v3434_v0 }
0x2f1b   :  { %3385 = vrot.lane.b32.xlu1 %v4206_v45, %s4340_s18 }
0x2f1c   :  { %3439 = vrot.lane.b32.xlu0 %v3437_v9, %s4341_s19 }
0x2f20   :  { %3447 = vrot.lane.b32.xlu0 %v3445_v39, %s4341_s19 }
0x2f24   :  { %3455 = vrot.lane.b32.xlu0 %v3453_v12, %s4341_s19 }
0x2f28   :  { %3463 = vrot.lane.b32.xlu0 %v3461_v16, %s4341_s19 }
0x2f2c   :  { %3479 = vrot.lane.b32.xlu0 %v3477_v21, %s4341_s19 }
0x2f8f   :  { %v3428_v10 = vpop.xlane.xlu0 %3427 }
0x2f90   :  { %v3498_v13 = vsel %vm3497_vm4, %v3496_v61, %v3428_v10 }
0x2f93   :  { %v3440_v11 = vpop.permute.xlu0 %3439  ;;  %v3436_v17 = vpop.xlane.xlu1 %3435 }
0x2f94   :  { %v3442_v33 = vsel %vm230_vm1, %v3440_v11, 0.0  ;;  %v3500_v38 = vsel %vm3499_vm5, %v3498_v13, %v3436_v17 }
0x2f95   :  { %3443 = vadd.xlane.f32.xlu1 %v3442_v33 }
0x2f97   :  { %v3448_v2 = vpop.permute.xlu0 %3447  ;;  %v3386_v28 = vpop.permute.xlu1 %3385 }
0x2f98   :  { %v3450_v4 = vsel %vm230_vm1, %v3448_v2, 0.0  ;;  %v3388_v41 = vmul.f32 %v3386_v28, %v5152_v49 }
0x2f99   :  { %3451 = vadd.xlane.f32.xlu1 %v3450_v4 }
0x2f9a   :  { %v3485_v6 = vmul.f32 %v5160_v26, %v3388_v41 }
0x2f9b   :  { %v3456_v40 = vpop.permute.xlu0 %3455 }
0x2f9c   :  { %v3458_v29 = vsel %vm230_vm1, %v3456_v40, 0.0  ;;  %3487 = vrot.lane.b32.xlu0 %v3485_v6, %s4341_s19 }
0x2f9d   :  { %3459 = vadd.xlane.f32.xlu1 %v3458_v29 }
0x2f9f   :  { %v3464_v44 = vpop.permute.xlu0 %3463 }
0x2fa0   :  { %v3466_v42 = vsel %vm230_vm1, %v3464_v44, 0.0 }
0x2fa3   :  { %v3480_v1 = vpop.permute.xlu0 %3479 }
0x2fa4   :  { %v3482_v47 = vsel %vm230_vm1, %v3480_v1, 0.0 }
0x2fae   :  { %3471 = vrot.lane.b32.xlu1 %v3469_v15, %s4341_s19 }
0x2fbb   :  { %3467 = vadd.xlane.f32.xlu0 %v3466_v42 }
0x2fbf   :  { %3483 = vadd.xlane.f32.xlu0 %v3482_v47 }
0x300e   :  { %v3488_v30 = vpop.permute.xlu0 %3487 }
0x300f   :  { %v3490_v36 = vsel %vm230_vm1, %v3488_v30, 0.0 }
0x3010   :  { %3491 = vadd.xlane.f32.xlu0 %v3490_v36 }
0x301e   :  { %v3444_v18 = vpop.xlane.xlu1 %3443 }
0x301f   :  { %v3502_v20 = vsel %vm3501_vm6, %v3500_v38, %v3444_v18 }
0x3022   :  { %v3452_v24 = vpop.xlane.xlu1 %3451 }
0x3023   :  { %v3504_v22 = vsel %vm3503_vm7, %v3502_v20, %v3452_v24 }
0x3026   :  { %v3460_v25 = vpop.xlane.xlu1 %3459  ;;  %3521 = vperm.xlu0 %4110, %v3583_v23  }
0x3027   :  { %v3506_v35 = vsel %vm3505_vm8, %v3504_v22, %v3460_v25 }
0x302a   :  { %v3472_v48 = vpop.permute.xlu1 %3471 }
0x302b   :  { %v3474_v50 = vsel %vm230_vm1, %v3472_v48, 0.0 }
0x302c   :  { %3475 = vadd.xlane.f32.xlu1 %v3474_v50 }
0x3044   :  { %v3468_v49 = vpop.xlane.xlu0 %3467 }
0x3045   :  { %v3508_v54 = vsel %vm3507_vm9, %v3506_v35, %v3468_v49 }
0x3048   :  { %v3484_v51 = vpop.xlane.xlu0 %3483 }
0x3099   :  { %v3492_v53 = vpop.xlane.xlu0 %3491 }
0x30a1   :  { %v3522_v3 = vpop.permute.xlu0 %3521 }
0x30b5   :  { %v3476_v56 = vpop.xlane.xlu1 %3475 }
0x30b6   :  { %v3510_v26 = vsel %vm3509_vm10, %v3508_v54, %v3476_v56 }
0x30b7   :  { %v3512_v31 = vsel %vm3511_vm11, %v3510_v26, %v3484_v51 }
0x30b8   :  { %v3514_v5 = vsel %vm3513_vm12, %v3512_v31, %v3492_v53 }
0x30b9   :  { %v3524_v32 = vadd.f32 %v3522_v3, %v3514_v5 }
0x30bb   :  { %3526 = vst.msk [vmem:[#allocation11] sm:$0xff] %vm3525_vm13, %v3524_v32 }
0x30bc   :  { %4313 = shalt.err (!%p4310_p10)
}
0x30bd   :  { %3536 = dma.vmem_to_hbm [thread:$0]  %s3534_s27, 128, %s5226_s10, [#allocation5]  }
0x30be   :  { %4328 = dma.done.wait [#allocation5], 128  }
0x30bf   :  { %4329 = vsyncadd [#allocation5], 4294967168 }
0x30c0   :  { %3540 = vsyncpa [#allocation4], 1 }
0x30c1   :  { %3541 = vsyncpa [#allocation7], 1 }
0x30c2   :  { %3542 = vsyncpa [#allocation10], 1 }
0x30c3   :  { %3543 = vsyncpa [#allocation5], 1 }

</bundles_post_ra>
